<compile_context>
chip_gen: v7x
topology: tpu7x:2x2x1
jax: 0.10.0
libtpu: 0.0.40
codegen_flags: <defaults>
</compile_context>

<pallas_src>
import jax
import jax.numpy as jnp
from jax import lax
from jax.experimental import pallas as pl
from jax.experimental.pallas import tpu as pltpu  # noqa: F401  (kept for TPU-specific tuning hooks)


def _round_up(x, m):
    return -(-x // m) * m


def _mm_tiny_k(a, b):
    """(m, k) @ (k, n) with a tiny static k: unrolled broadcast-FMAs on the VPU.

    Used for every contraction over Fin / Fout (k == 2 here) so no K=2 MXU pass
    (and none of its padding) is ever emitted."""
    acc = a[:, 0:1] * b[0:1, :]
    for kk in range(1, a.shape[1]):
        acc = acc + a[:, kk:kk + 1] * b[kk:kk + 1, :]
    return acc


# --------------------------- fused Pallas kernel ---------------------------- #

def _evolvegcn_fused_kernel(a_ref, x_ref, xt_ref, u_ref, idx_ref, p_ref,
                            gsq_ref, gb_ref, out_ref, wfin_ref):
    """Whole EvolveGCN_1_layer forward, VMEM-resident (grid=()).

    a_ref   : (T, N, N)      dense adjacency (f32)
    x_ref   : (T, N, Fin)    node features (f32)
    xt_ref  : (T, Fin, N)    pre-transposed node features (f32)
    u_ref   : (2*Fout, Fp)   output projection, zero-padded to Fp=128 lanes
    idx_ref : (Ep, 2) int32  col0 = t*N+src, col1 = T*N + t*N+trg (zero-padded rows)
    p_ref   : (1, Fin)       summarize() scoring vector
    gsq_ref : (6, Fin, Fin)  W_Z, U_Z, W_R, U_R, W_H, U_H
    gb_ref  : (4, Fin, Fout) B_Z, B_R, B_H, W_init
    out_ref : (Ep, Fp)       edge scores; valid block = [:E, :Fhid]
    wfin_ref: (Fin, Fout)    final evolved GCN weight
    """
    T, N, Fin = x_ref.shape
    Fout = gb_ref.shape[-1]
    TN = T * N
    Ep = out_ref.shape[0]

    W_Z, U_Z, W_R, U_R, W_H, U_H = (gsq_ref[i] for i in range(6))
    B_Z, B_R, B_H = gb_ref[0], gb_ref[1], gb_ref[2]
    W = gb_ref[3]                                    # W_init; evolved below.

    u_pad = u_ref[...]
    u_src = u_pad[:Fout, :]                          # (Fout, Fp)
    u_trg = u_pad[Fout:, :]                          # (Fout, Fp)

    p_row = p_ref[...]                               # (1, Fin)
    p_norm = jnp.sqrt(jnp.sum(p_row * p_row, axis=1, keepdims=True))   # (1, 1)

    row_iota = lax.broadcasted_iota(jnp.int32, (N, 1), 0).astype(jnp.float32)
    lane_iota = lax.broadcasted_iota(jnp.int32, (1, N), 1).astype(jnp.float32)
    col_iota_ff = lax.broadcasted_iota(jnp.int32, (Fin, Fout), 1)

    p_tiles, q_tiles = [], []
    for t in range(T):                               # T small & static -> unrolled.
        Xt = x_ref[t]                                # (N, Fin)
        XtT = xt_ref[t]                              # (Fin, N)
        At = a_ref[t]                                # (N, N)

        # ---- summarize(): top-Fout rows of Xt scored by y = Xt@p / ||p|| ----
        # torch.topk done as Fout masked argmax passes (first index on ties).
        y = jnp.sum(Xt * p_row, axis=1, keepdims=True) / p_norm        # (N, 1)
        remaining = y
        Xg = jnp.zeros((Fin, Fout), jnp.float32)     # == summarize(Xt, Fout).T
        for j in range(Fout):
            m = jnp.max(remaining, axis=0, keepdims=True)              # (1, 1)
            idxf = jnp.min(jnp.where(remaining == m, row_iota, float(N)),
                           axis=0, keepdims=True)                      # first argmax
            sel_row = (lane_iota == idxf).astype(jnp.float32)          # (1, N)
            xg_col = jnp.sum(XtT * sel_row, axis=1, keepdims=True) * m  # (Fin, 1)
            Xg = Xg + jnp.where(col_iota_ff == j, xg_col, 0.0)
            remaining = jnp.where(row_iota == idxf, -1e30, remaining)

        # ---- GRU cell evolving W (all (Fin, Fout) tiles; pure VPU) -----------
        Zg = jax.nn.sigmoid(_mm_tiny_k(W_Z, Xg) + _mm_tiny_k(U_Z, W) + B_Z)
        Rg = jax.nn.sigmoid(_mm_tiny_k(W_R, Xg) + _mm_tiny_k(U_R, W) + B_R)
        Hg = jnp.tanh(_mm_tiny_k(W_H, Xg) + _mm_tiny_k(U_H, Rg * W) + B_H)
        W = (1.0 - Zg) * W + Zg * Hg

        # ---- GCONV with U folded in: lane-dense (N, Fp) tiles, no scratch ----
        #   P_t = A_t @ (X_t @ (W @ U_src)),  Q_t = A_t @ (X_t @ (W @ U_trg))
        # (nonlin=False for the single/last layer in the reference -> no ReLU.)
        wps = _mm_tiny_k(W, u_src)                   # (Fin, Fp)
        wpt = _mm_tiny_k(W, u_trg)                   # (Fin, Fp)
        p_tiles.append(jnp.dot(At, _mm_tiny_k(Xt, wps),
                               preferred_element_type=jnp.float32))     # (N, Fp)
        q_tiles.append(jnp.dot(At, _mm_tiny_k(Xt, wpt),
                               preferred_element_type=jnp.float32))     # (N, Fp)

    pq = jnp.concatenate(p_tiles + q_tiles, axis=0)                     # (2*TN, Fp)

    # ---- edge gather: single merged one-hot selection matmul (MXU) ----------
    #   out[e] = P[src[e]] + Q[trg[e]] = (sel_src | sel_trg) @ [P ; Q]
    idx = idx_ref[...]
    cols = lax.broadcasted_iota(jnp.int32, (Ep, 2 * TN), 1)
    sel = jnp.logical_or(cols == idx[:, 0:1],
                         cols == idx[:, 1:2]).astype(jnp.float32)       # (Ep, 2*TN)
    out_ref[...] = jnp.dot(sel, pq, preferred_element_type=jnp.float32)
    wfin_ref[...] = W


# --------------------------------- forward ---------------------------------- #

def evolvegcn_forward(A, X, edges, params):
    """output[e] = concat(Y_flat[src_e], Y_flat[trg_e]) @ U, with
    Y[t] = (A[t] @ X[t]) @ W[t] and W[t] = GRU(summarize(X[t]), W[t-1]).
    The whole forward is one VMEM-resident pallas_call."""
    T, N, Fin = X.shape
    lp = params["layer0"]
    U = params["U"]
    Fout = lp["W_init"].shape[1]
    Fhid = U.shape[1]
    E = edges.shape[1]
    TN = T * N

    Ep = _round_up(max(E, 8), 8)         # sublane-aligned edge rows
    Fp = _round_up(Fhid, 128)            # lane-dense output (unmasked vst)

    f32 = jnp.float32
    # Output projection zero-padded to Fp lanes; src/trg halves split in-kernel.
    U_pad = jnp.zeros((2 * Fout, Fp), f32).at[:, :Fhid].set(U.astype(f32))

    # Packed edge endpoints: col0 = t*N+src, col1 = TN + t*N+trg
    # (matches edges[[0,1]].T @ [N, 1] / edges[[0,2]].T @ [N, 1] in the reference).
    # Padded rows select row 0 of P -> harmless, sliced away below.
    src = edges[0] * N + edges[1]
    trg = edges[0] * N + edges[2] + TN
    idx = jnp.zeros((Ep, 2), jnp.int32).at[:E, :].set(
        jnp.stack([src, trg], axis=1).astype(jnp.int32))

    # GRU parameters packed into 3 small buffers (short DMA prologue).
    gsq = jnp.stack([lp["W_Z"], lp["U_Z"], lp["W_R"],
                     lp["U_R"], lp["W_H"], lp["U_H"]]).astype(f32)
    gb = jnp.stack([lp["B_Z"], lp["B_R"], lp["B_H"], lp["W_init"]]).astype(f32)
    p_row = lp["p"].reshape(1, Fin).astype(f32)

    XT = jnp.swapaxes(X, 1, 2)           # pre-transposed: no in-kernel transposes

    out_pad, W_final = pl.pallas_call(
        _evolvegcn_fused_kernel,
        out_shape=(jax.ShapeDtypeStruct((Ep, Fp), f32),
                   jax.ShapeDtypeStruct((Fin, Fout), f32)),
    )(A.astype(f32), X.astype(f32), XT.astype(f32), U_pad, idx, p_row, gsq, gb)

    return out_pad[:E, :Fhid], W_final


# --------------------------- pure-JAX reference ------------------------------ #

def _summarize(Xt, k, p):
    y = (Xt @ p) / jnp.linalg.norm(p)
    _, idx = jax.lax.top_k(y, k)
    return Xt[idx, :] * y[idx][:, None]                   # (k, Fin)


def _gru_cell(Xt, W_old, lp):
    Xg = _summarize(Xt, W_old.shape[1], lp["p"]).T        # (Fin, Fout)
    Z = jax.nn.sigmoid(lp["W_Z"] @ Xg + lp["U_Z"] @ W_old + lp["B_Z"])
    R = jax.nn.sigmoid(lp["W_R"] @ Xg + lp["U_R"] @ W_old + lp["B_R"])
    Ht = jnp.tanh(lp["W_H"] @ Xg + lp["U_H"] @ (R * W_old) + lp["B_H"])
    return (1.0 - Z) * W_old + Z * Ht


def _reference_forward(A, X, edges, params):
    """Pure-JAX mirror of the PyTorch forward, for verification."""
    T, N, _ = X.shape

    def step(W_prev, Xt):
        W_new = _gru_cell(Xt, W_prev, params["layer0"])
        return W_new, W_new

    W_final, W_seq = jax.lax.scan(step, params["layer0"]["W_init"], X)
    Y = jnp.matmul(jnp.matmul(A, X), W_seq)
    Y_flat = Y.reshape(T * N, -1)
    src = edges[0] * N + edges[1]
    trg = edges[0] * N + edges[2]
    Y_mat = jnp.concatenate([Y_flat[src], Y_flat[trg]], axis=1)
    return Y_mat @ params["U"], W_final


# ----------------------------------- main ------------------------------------ #

if __name__ == "__main__":
    T, N, E = 4, 16, 20
    F = [2, 2, 2]

    key = jax.random.PRNGKey(0)
    keys = jax.random.split(key, 20)

    # Inputs
    X = jax.random.normal(keys[0], (T, N, F[0]), dtype=jnp.float32)
    A = (jax.random.uniform(keys[1], (T, N, N)) < 0.3).astype(jnp.float32)
    edges = jnp.stack([
        jax.random.randint(keys[2], (E,), 0, T),
        jax.random.randint(keys[3], (E,), 0, N),
        jax.random.randint(keys[4], (E,), 0, N),
    ]).astype(jnp.int32)

    def rn(k, shape):
        return jax.random.normal(k, shape, dtype=jnp.float32)

    # Deterministic parameter init (shapes per EvolveGCN_1_layer.__init__, F=[2,2,2]).
    params = {
        "layer0": {
            "p":      rn(keys[5],  (F[0],)),
            "W_Z":    rn(keys[6],  (F[0], F[0])),
            "U_Z":    rn(keys[7],  (F[0], F[0])),
            "B_Z":    rn(keys[8],  (F[0], F[1])),
            "W_R":    rn(keys[9],  (F[0], F[0])),
            "U_R":    rn(keys[10], (F[0], F[0])),
            "B_R":    rn(keys[11], (F[0], F[1])),
            "W_H":    rn(keys[12], (F[0], F[0])),
            "U_H":    rn(keys[13], (F[0], F[0])),
            "B_H":    rn(keys[14], (F[0], F[1])),
            "W_init": rn(keys[15], (F[0], F[1])),
        },
        "U": rn(keys[16], (F[-2] * 2, F[-1])),
    }

    out, W_final = jax.jit(evolvegcn_forward)(A, X, edges, params)
    out, W_final = jax.block_until_ready((out, W_final))

    ref_out, ref_W = _reference_forward(A, X, edges, params)
    assert out.shape == (E, F[-1]), out.shape
    assert W_final.shape == (F[0], F[1]), W_final.shape
    assert jnp.allclose(out, ref_out, atol=1e-4, rtol=1e-4), (
        f"max abs err = {jnp.max(jnp.abs(out - ref_out))}")
    assert jnp.allclose(W_final, ref_W, atol=1e-4, rtol=1e-4), (
        f"max abs err (W) = {jnp.max(jnp.abs(W_final - ref_W))}")

    print("KERNEL_OK")
</pallas_src>

<mosaic_0001>
module attributes {stable_mosaic.version = 11 : i64} {
  func.func @_evolvegcn_fused_kernel(%arg0: memref<4x16x16xf32, #tpu.memory_space<vmem>>, %arg1: memref<4x16x2xf32, #tpu.memory_space<vmem>>, %arg2: memref<4x2x16xf32, #tpu.memory_space<vmem>>, %arg3: memref<4x128xf32, #tpu.memory_space<vmem>>, %arg4: memref<24x2xi32, #tpu.memory_space<vmem>>, %arg5: memref<1x2xf32, #tpu.memory_space<vmem>>, %arg6: memref<6x2x2xf32, #tpu.memory_space<vmem>>, %arg7: memref<4x2x2xf32, #tpu.memory_space<vmem>>, %arg8: memref<24x128xf32, #tpu.memory_space<vmem>>, %arg9: memref<2x2xf32, #tpu.memory_space<vmem>>) attributes {dimension_semantics = [], scalar_prefetch = 0 : i64, scratch_operands = 0 : i64, tpu.core_type = #tpu.core_type<tc>} {
    %c0 = arith.constant 0 : index
    %c0_0 = arith.constant 0 : index
    %c0_1 = arith.constant 0 : index
    %0 = vector.load %arg6[%c0, %c0_0, %c0_1] : memref<6x2x2xf32, #tpu.memory_space<vmem>>, vector<1x2x2xf32>
    %1 = vector.shape_cast %0 : vector<1x2x2xf32> to vector<2x2xf32>
    %c1 = arith.constant 1 : index
    %c0_2 = arith.constant 0 : index
    %c0_3 = arith.constant 0 : index
    %2 = vector.load %arg6[%c1, %c0_2, %c0_3] : memref<6x2x2xf32, #tpu.memory_space<vmem>>, vector<1x2x2xf32>
    %3 = vector.shape_cast %2 : vector<1x2x2xf32> to vector<2x2xf32>
    %c2 = arith.constant 2 : index
    %c0_4 = arith.constant 0 : index
    %c0_5 = arith.constant 0 : index
    %4 = vector.load %arg6[%c2, %c0_4, %c0_5] : memref<6x2x2xf32, #tpu.memory_space<vmem>>, vector<1x2x2xf32>
    %5 = vector.shape_cast %4 : vector<1x2x2xf32> to vector<2x2xf32>
    %c3 = arith.constant 3 : index
    %c0_6 = arith.constant 0 : index
    %c0_7 = arith.constant 0 : index
    %6 = vector.load %arg6[%c3, %c0_6, %c0_7] : memref<6x2x2xf32, #tpu.memory_space<vmem>>, vector<1x2x2xf32>
    %7 = vector.shape_cast %6 : vector<1x2x2xf32> to vector<2x2xf32>
    %c4 = arith.constant 4 : index
    %c0_8 = arith.constant 0 : index
    %c0_9 = arith.constant 0 : index
    %8 = vector.load %arg6[%c4, %c0_8, %c0_9] : memref<6x2x2xf32, #tpu.memory_space<vmem>>, vector<1x2x2xf32>
    %9 = vector.shape_cast %8 : vector<1x2x2xf32> to vector<2x2xf32>
    %c5 = arith.constant 5 : index
    %c0_10 = arith.constant 0 : index
    %c0_11 = arith.constant 0 : index
    %10 = vector.load %arg6[%c5, %c0_10, %c0_11] : memref<6x2x2xf32, #tpu.memory_space<vmem>>, vector<1x2x2xf32>
    %11 = vector.shape_cast %10 : vector<1x2x2xf32> to vector<2x2xf32>
    %c0_12 = arith.constant 0 : index
    %c0_13 = arith.constant 0 : index
    %c0_14 = arith.constant 0 : index
    %12 = vector.load %arg7[%c0_12, %c0_13, %c0_14] : memref<4x2x2xf32, #tpu.memory_space<vmem>>, vector<1x2x2xf32>
    %13 = vector.shape_cast %12 : vector<1x2x2xf32> to vector<2x2xf32>
    %c1_15 = arith.constant 1 : index
    %c0_16 = arith.constant 0 : index
    %c0_17 = arith.constant 0 : index
    %14 = vector.load %arg7[%c1_15, %c0_16, %c0_17] : memref<4x2x2xf32, #tpu.memory_space<vmem>>, vector<1x2x2xf32>
    %15 = vector.shape_cast %14 : vector<1x2x2xf32> to vector<2x2xf32>
    %c2_18 = arith.constant 2 : index
    %c0_19 = arith.constant 0 : index
    %c0_20 = arith.constant 0 : index
    %16 = vector.load %arg7[%c2_18, %c0_19, %c0_20] : memref<4x2x2xf32, #tpu.memory_space<vmem>>, vector<1x2x2xf32>
    %17 = vector.shape_cast %16 : vector<1x2x2xf32> to vector<2x2xf32>
    %c3_21 = arith.constant 3 : index
    %c0_22 = arith.constant 0 : index
    %c0_23 = arith.constant 0 : index
    %18 = vector.load %arg7[%c3_21, %c0_22, %c0_23] : memref<4x2x2xf32, #tpu.memory_space<vmem>>, vector<1x2x2xf32>
    %19 = vector.shape_cast %18 : vector<1x2x2xf32> to vector<2x2xf32>
    %c0_24 = arith.constant 0 : index
    %c0_25 = arith.constant 0 : index
    %20 = vector.load %arg3[%c0_24, %c0_25] : memref<4x128xf32, #tpu.memory_space<vmem>>, vector<4x128xf32>
    %21 = vector.extract_strided_slice %20 {offsets = [0, 0], sizes = [2, 128], strides = [1, 1]} : vector<4x128xf32> to vector<2x128xf32>
    %22 = vector.extract_strided_slice %20 {offsets = [2, 0], sizes = [2, 128], strides = [1, 1]} : vector<4x128xf32> to vector<2x128xf32>
    %c0_26 = arith.constant 0 : index
    %c0_27 = arith.constant 0 : index
    %23 = vector.load %arg5[%c0_26, %c0_27] : memref<1x2xf32, #tpu.memory_space<vmem>>, vector<1x2xf32>
    %24 = arith.mulf %23, %23 : vector<1x2xf32>
    %cst = arith.constant dense<0.000000e+00> : vector<1xf32>
    %25 = vector.multi_reduction <add>, %24, %cst [1] : vector<1x2xf32> to vector<1xf32>
    %26 = vector.shape_cast %25 : vector<1xf32> to vector<1x1xf32>
    %27 = math.sqrt %26 : vector<1x1xf32>
    %28 = tpu.iota {dimensions = array<i32: 0>} : vector<16x1xi32>
    %29 = arith.sitofp %28 : vector<16x1xi32> to vector<16x1xf32>
    %30 = tpu.iota {dimensions = array<i32: 1>} : vector<1x16xi32>
    %31 = arith.sitofp %30 : vector<1x16xi32> to vector<1x16xf32>
    %32 = tpu.iota {dimensions = array<i32: 1>} : vector<2x2xi32>
    %c0_28 = arith.constant 0 : index
    %c0_29 = arith.constant 0 : index
    %c0_30 = arith.constant 0 : index
    %33 = vector.load %arg1[%c0_28, %c0_29, %c0_30] : memref<4x16x2xf32, #tpu.memory_space<vmem>>, vector<1x16x2xf32>
    %34 = vector.shape_cast %33 : vector<1x16x2xf32> to vector<16x2xf32>
    %c0_31 = arith.constant 0 : index
    %c0_32 = arith.constant 0 : index
    %c0_33 = arith.constant 0 : index
    %35 = vector.load %arg2[%c0_31, %c0_32, %c0_33] : memref<4x2x16xf32, #tpu.memory_space<vmem>>, vector<1x2x16xf32>
    %36 = vector.shape_cast %35 : vector<1x2x16xf32> to vector<2x16xf32>
    %c0_34 = arith.constant 0 : index
    %c0_35 = arith.constant 0 : index
    %c0_36 = arith.constant 0 : index
    %37 = vector.load %arg0[%c0_34, %c0_35, %c0_36] : memref<4x16x16xf32, #tpu.memory_space<vmem>>, vector<1x16x16xf32>
    %38 = vector.shape_cast %37 : vector<1x16x16xf32> to vector<16x16xf32>
    %39 = vector.broadcast %23 : vector<1x2xf32> to vector<16x2xf32>
    %40 = arith.mulf %34, %39 : vector<16x2xf32>
    %cst_37 = arith.constant dense<0.000000e+00> : vector<16xf32>
    %41 = vector.multi_reduction <add>, %40, %cst_37 [1] : vector<16x2xf32> to vector<16xf32>
    %42 = vector.shape_cast %41 : vector<16xf32> to vector<16x1xf32>
    %43 = vector.broadcast %27 : vector<1x1xf32> to vector<16x1xf32>
    %44 = arith.divf %42, %43 : vector<16x1xf32>
    %cst_38 = arith.constant 0.000000e+00 : f32
    %45 = vector.broadcast %cst_38 : f32 to vector<2x2xf32>
    %cst_39 = arith.constant dense<0xFF800000> : vector<1xf32>
    %46 = vector.multi_reduction <maximumf>, %44, %cst_39 [0] : vector<16x1xf32> to vector<1xf32>
    %47 = vector.shape_cast %46 : vector<1xf32> to vector<1x1xf32>
    %48 = vector.broadcast %47 : vector<1x1xf32> to vector<16x1xf32>
    %49 = arith.cmpf oeq, %44, %48 : vector<16x1xf32>
    %cst_40 = arith.constant 1.600000e+01 : f32
    %50 = vector.broadcast %cst_40 : f32 to vector<16x1xf32>
    %51 = arith.select %49, %29, %50 : vector<16x1xi1>, vector<16x1xf32>
    %cst_41 = arith.constant dense<0x7F800000> : vector<1xf32>
    %52 = vector.multi_reduction <minimumf>, %51, %cst_41 [0] : vector<16x1xf32> to vector<1xf32>
    %53 = vector.shape_cast %52 : vector<1xf32> to vector<1x1xf32>
    %54 = vector.broadcast %53 : vector<1x1xf32> to vector<1x16xf32>
    %55 = arith.cmpf oeq, %31, %54 : vector<1x16xf32>
    %56 = arith.extui %55 : vector<1x16xi1> to vector<1x16xi32>
    %57 = arith.sitofp %56 : vector<1x16xi32> to vector<1x16xf32>
    %58 = vector.broadcast %57 : vector<1x16xf32> to vector<2x16xf32>
    %59 = arith.mulf %36, %58 : vector<2x16xf32>
    %cst_42 = arith.constant dense<0.000000e+00> : vector<2xf32>
    %60 = vector.multi_reduction <add>, %59, %cst_42 [1] : vector<2x16xf32> to vector<2xf32>
    %61 = vector.shape_cast %60 : vector<2xf32> to vector<2x1xf32>
    %62 = vector.broadcast %47 : vector<1x1xf32> to vector<2x1xf32>
    %63 = arith.mulf %61, %62 : vector<2x1xf32>
    %c0_i32 = arith.constant 0 : i32
    %64 = vector.broadcast %c0_i32 : i32 to vector<2x2xi32>
    %65 = arith.cmpi eq, %32, %64 : vector<2x2xi32>
    %cst_43 = arith.constant 0.000000e+00 : f32
    %66 = vector.shape_cast %63 : vector<2x1xf32> to vector<2x1xf32>
    %67 = vector.broadcast %66 : vector<2x1xf32> to vector<2x2xf32>
    %68 = vector.broadcast %cst_43 : f32 to vector<2x2xf32>
    %69 = arith.select %65, %67, %68 : vector<2x2xi1>, vector<2x2xf32>
    %70 = arith.addf %45, %69 : vector<2x2xf32>
    %71 = vector.broadcast %53 : vector<1x1xf32> to vector<16x1xf32>
    %72 = arith.cmpf oeq, %29, %71 : vector<16x1xf32>
    %cst_44 = arith.constant -1.000000e+30 : f32
    %73 = vector.broadcast %cst_44 : f32 to vector<16x1xf32>
    %74 = arith.select %72, %73, %44 : vector<16x1xi1>, vector<16x1xf32>
    %cst_45 = arith.constant dense<0xFF800000> : vector<1xf32>
    %75 = vector.multi_reduction <maximumf>, %74, %cst_45 [0] : vector<16x1xf32> to vector<1xf32>
    %76 = vector.shape_cast %75 : vector<1xf32> to vector<1x1xf32>
    %77 = vector.broadcast %76 : vector<1x1xf32> to vector<16x1xf32>
    %78 = arith.cmpf oeq, %74, %77 : vector<16x1xf32>
    %cst_46 = arith.constant 1.600000e+01 : f32
    %79 = vector.broadcast %cst_46 : f32 to vector<16x1xf32>
    %80 = arith.select %78, %29, %79 : vector<16x1xi1>, vector<16x1xf32>
    %cst_47 = arith.constant dense<0x7F800000> : vector<1xf32>
    %81 = vector.multi_reduction <minimumf>, %80, %cst_47 [0] : vector<16x1xf32> to vector<1xf32>
    %82 = vector.shape_cast %81 : vector<1xf32> to vector<1x1xf32>
    %83 = vector.broadcast %82 : vector<1x1xf32> to vector<1x16xf32>
    %84 = arith.cmpf oeq, %31, %83 : vector<1x16xf32>
    %85 = arith.extui %84 : vector<1x16xi1> to vector<1x16xi32>
    %86 = arith.sitofp %85 : vector<1x16xi32> to vector<1x16xf32>
    %87 = vector.broadcast %86 : vector<1x16xf32> to vector<2x16xf32>
    %88 = arith.mulf %36, %87 : vector<2x16xf32>
    %cst_48 = arith.constant dense<0.000000e+00> : vector<2xf32>
    %89 = vector.multi_reduction <add>, %88, %cst_48 [1] : vector<2x16xf32> to vector<2xf32>
    %90 = vector.shape_cast %89 : vector<2xf32> to vector<2x1xf32>
    %91 = vector.broadcast %76 : vector<1x1xf32> to vector<2x1xf32>
    %92 = arith.mulf %90, %91 : vector<2x1xf32>
    %c1_i32 = arith.constant 1 : i32
    %93 = vector.broadcast %c1_i32 : i32 to vector<2x2xi32>
    %94 = arith.cmpi eq, %32, %93 : vector<2x2xi32>
    %cst_49 = arith.constant 0.000000e+00 : f32
    %95 = vector.shape_cast %92 : vector<2x1xf32> to vector<2x1xf32>
    %96 = vector.broadcast %95 : vector<2x1xf32> to vector<2x2xf32>
    %97 = vector.broadcast %cst_49 : f32 to vector<2x2xf32>
    %98 = arith.select %94, %96, %97 : vector<2x2xi1>, vector<2x2xf32>
    %99 = arith.addf %70, %98 : vector<2x2xf32>
    %100 = vector.extract_strided_slice %1 {offsets = [0, 0], sizes = [2, 1], strides = [1, 1]} : vector<2x2xf32> to vector<2x1xf32>
    %101 = vector.extract_strided_slice %99 {offsets = [0, 0], sizes = [1, 2], strides = [1, 1]} : vector<2x2xf32> to vector<1x2xf32>
    %102 = vector.broadcast %100 : vector<2x1xf32> to vector<2x2xf32>
    %103 = vector.broadcast %101 : vector<1x2xf32> to vector<2x2xf32>
    %104 = arith.mulf %102, %103 : vector<2x2xf32>
    %105 = vector.extract_strided_slice %1 {offsets = [0, 1], sizes = [2, 1], strides = [1, 1]} : vector<2x2xf32> to vector<2x1xf32>
    %106 = vector.extract_strided_slice %99 {offsets = [1, 0], sizes = [1, 2], strides = [1, 1]} : vector<2x2xf32> to vector<1x2xf32>
    %107 = vector.broadcast %105 : vector<2x1xf32> to vector<2x2xf32>
    %108 = vector.broadcast %106 : vector<1x2xf32> to vector<2x2xf32>
    %109 = arith.mulf %107, %108 : vector<2x2xf32>
    %110 = arith.addf %104, %109 : vector<2x2xf32>
    %111 = vector.extract_strided_slice %3 {offsets = [0, 0], sizes = [2, 1], strides = [1, 1]} : vector<2x2xf32> to vector<2x1xf32>
    %112 = vector.extract_strided_slice %19 {offsets = [0, 0], sizes = [1, 2], strides = [1, 1]} : vector<2x2xf32> to vector<1x2xf32>
    %113 = vector.broadcast %111 : vector<2x1xf32> to vector<2x2xf32>
    %114 = vector.broadcast %112 : vector<1x2xf32> to vector<2x2xf32>
    %115 = arith.mulf %113, %114 : vector<2x2xf32>
    %116 = vector.extract_strided_slice %3 {offsets = [0, 1], sizes = [2, 1], strides = [1, 1]} : vector<2x2xf32> to vector<2x1xf32>
    %117 = vector.extract_strided_slice %19 {offsets = [1, 0], sizes = [1, 2], strides = [1, 1]} : vector<2x2xf32> to vector<1x2xf32>
    %118 = vector.broadcast %116 : vector<2x1xf32> to vector<2x2xf32>
    %119 = vector.broadcast %117 : vector<1x2xf32> to vector<2x2xf32>
    %120 = arith.mulf %118, %119 : vector<2x2xf32>
    %121 = arith.addf %115, %120 : vector<2x2xf32>
    %122 = arith.addf %110, %121 : vector<2x2xf32>
    %123 = arith.addf %122, %13 : vector<2x2xf32>
    %124 = arith.negf %123 : vector<2x2xf32>
    %125 = math.exp %124 : vector<2x2xf32>
    %cst_50 = arith.constant 1.000000e+00 : f32
    %126 = vector.broadcast %cst_50 : f32 to vector<2x2xf32>
    %127 = arith.addf %126, %125 : vector<2x2xf32>
    %128 = arith.divf %126, %127 : vector<2x2xf32>
    %129 = vector.extract_strided_slice %5 {offsets = [0, 0], sizes = [2, 1], strides = [1, 1]} : vector<2x2xf32> to vector<2x1xf32>
    %130 = vector.extract_strided_slice %99 {offsets = [0, 0], sizes = [1, 2], strides = [1, 1]} : vector<2x2xf32> to vector<1x2xf32>
    %131 = vector.broadcast %129 : vector<2x1xf32> to vector<2x2xf32>
    %132 = vector.broadcast %130 : vector<1x2xf32> to vector<2x2xf32>
    %133 = arith.mulf %131, %132 : vector<2x2xf32>
    %134 = vector.extract_strided_slice %5 {offsets = [0, 1], sizes = [2, 1], strides = [1, 1]} : vector<2x2xf32> to vector<2x1xf32>
    %135 = vector.extract_strided_slice %99 {offsets = [1, 0], sizes = [1, 2], strides = [1, 1]} : vector<2x2xf32> to vector<1x2xf32>
    %136 = vector.broadcast %134 : vector<2x1xf32> to vector<2x2xf32>
    %137 = vector.broadcast %135 : vector<1x2xf32> to vector<2x2xf32>
    %138 = arith.mulf %136, %137 : vector<2x2xf32>
    %139 = arith.addf %133, %138 : vector<2x2xf32>
    %140 = vector.extract_strided_slice %7 {offsets = [0, 0], sizes = [2, 1], strides = [1, 1]} : vector<2x2xf32> to vector<2x1xf32>
    %141 = vector.extract_strided_slice %19 {offsets = [0, 0], sizes = [1, 2], strides = [1, 1]} : vector<2x2xf32> to vector<1x2xf32>
    %142 = vector.broadcast %140 : vector<2x1xf32> to vector<2x2xf32>
    %143 = vector.broadcast %141 : vector<1x2xf32> to vector<2x2xf32>
    %144 = arith.mulf %142, %143 : vector<2x2xf32>
    %145 = vector.extract_strided_slice %7 {offsets = [0, 1], sizes = [2, 1], strides = [1, 1]} : vector<2x2xf32> to vector<2x1xf32>
    %146 = vector.extract_strided_slice %19 {offsets = [1, 0], sizes = [1, 2], strides = [1, 1]} : vector<2x2xf32> to vector<1x2xf32>
    %147 = vector.broadcast %145 : vector<2x1xf32> to vector<2x2xf32>
    %148 = vector.broadcast %146 : vector<1x2xf32> to vector<2x2xf32>
    %149 = arith.mulf %147, %148 : vector<2x2xf32>
    %150 = arith.addf %144, %149 : vector<2x2xf32>
    %151 = arith.addf %139, %150 : vector<2x2xf32>
    %152 = arith.addf %151, %15 : vector<2x2xf32>
    %153 = arith.negf %152 : vector<2x2xf32>
    %154 = math.exp %153 : vector<2x2xf32>
    %cst_51 = arith.constant 1.000000e+00 : f32
    %155 = vector.broadcast %cst_51 : f32 to vector<2x2xf32>
    %156 = arith.addf %155, %154 : vector<2x2xf32>
    %157 = arith.divf %155, %156 : vector<2x2xf32>
    %158 = vector.extract_strided_slice %9 {offsets = [0, 0], sizes = [2, 1], strides = [1, 1]} : vector<2x2xf32> to vector<2x1xf32>
    %159 = vector.extract_strided_slice %99 {offsets = [0, 0], sizes = [1, 2], strides = [1, 1]} : vector<2x2xf32> to vector<1x2xf32>
    %160 = vector.broadcast %158 : vector<2x1xf32> to vector<2x2xf32>
    %161 = vector.broadcast %159 : vector<1x2xf32> to vector<2x2xf32>
    %162 = arith.mulf %160, %161 : vector<2x2xf32>
    %163 = vector.extract_strided_slice %9 {offsets = [0, 1], sizes = [2, 1], strides = [1, 1]} : vector<2x2xf32> to vector<2x1xf32>
    %164 = vector.extract_strided_slice %99 {offsets = [1, 0], sizes = [1, 2], strides = [1, 1]} : vector<2x2xf32> to vector<1x2xf32>
    %165 = vector.broadcast %163 : vector<2x1xf32> to vector<2x2xf32>
    %166 = vector.broadcast %164 : vector<1x2xf32> to vector<2x2xf32>
    %167 = arith.mulf %165, %166 : vector<2x2xf32>
    %168 = arith.addf %162, %167 : vector<2x2xf32>
    %169 = arith.mulf %157, %19 : vector<2x2xf32>
    %170 = vector.extract_strided_slice %11 {offsets = [0, 0], sizes = [2, 1], strides = [1, 1]} : vector<2x2xf32> to vector<2x1xf32>
    %171 = vector.extract_strided_slice %169 {offsets = [0, 0], sizes = [1, 2], strides = [1, 1]} : vector<2x2xf32> to vector<1x2xf32>
    %172 = vector.broadcast %170 : vector<2x1xf32> to vector<2x2xf32>
    %173 = vector.broadcast %171 : vector<1x2xf32> to vector<2x2xf32>
    %174 = arith.mulf %172, %173 : vector<2x2xf32>
    %175 = vector.extract_strided_slice %11 {offsets = [0, 1], sizes = [2, 1], strides = [1, 1]} : vector<2x2xf32> to vector<2x1xf32>
    %176 = vector.extract_strided_slice %169 {offsets = [1, 0], sizes = [1, 2], strides = [1, 1]} : vector<2x2xf32> to vector<1x2xf32>
    %177 = vector.broadcast %175 : vector<2x1xf32> to vector<2x2xf32>
    %178 = vector.broadcast %176 : vector<1x2xf32> to vector<2x2xf32>
    %179 = arith.mulf %177, %178 : vector<2x2xf32>
    %180 = arith.addf %174, %179 : vector<2x2xf32>
    %181 = arith.addf %168, %180 : vector<2x2xf32>
    %182 = arith.addf %181, %17 : vector<2x2xf32>
    %183 = math.tanh %182 : vector<2x2xf32>
    %cst_52 = arith.constant 1.000000e+00 : f32
    %184 = vector.broadcast %cst_52 : f32 to vector<2x2xf32>
    %185 = arith.subf %184, %128 : vector<2x2xf32>
    %186 = arith.mulf %185, %19 : vector<2x2xf32>
    %187 = arith.mulf %128, %183 : vector<2x2xf32>
    %188 = arith.addf %186, %187 : vector<2x2xf32>
    %189 = vector.extract_strided_slice %188 {offsets = [0, 0], sizes = [2, 1], strides = [1, 1]} : vector<2x2xf32> to vector<2x1xf32>
    %190 = vector.extract_strided_slice %21 {offsets = [0, 0], sizes = [1, 128], strides = [1, 1]} : vector<2x128xf32> to vector<1x128xf32>
    %191 = vector.broadcast %189 : vector<2x1xf32> to vector<2x128xf32>
    %192 = vector.broadcast %190 : vector<1x128xf32> to vector<2x128xf32>
    %193 = arith.mulf %191, %192 : vector<2x128xf32>
    %194 = vector.extract_strided_slice %188 {offsets = [0, 1], sizes = [2, 1], strides = [1, 1]} : vector<2x2xf32> to vector<2x1xf32>
    %195 = vector.extract_strided_slice %21 {offsets = [1, 0], sizes = [1, 128], strides = [1, 1]} : vector<2x128xf32> to vector<1x128xf32>
    %196 = vector.broadcast %194 : vector<2x1xf32> to vector<2x128xf32>
    %197 = vector.broadcast %195 : vector<1x128xf32> to vector<2x128xf32>
    %198 = arith.mulf %196, %197 : vector<2x128xf32>
    %199 = arith.addf %193, %198 : vector<2x128xf32>
    %200 = vector.extract_strided_slice %188 {offsets = [0, 0], sizes = [2, 1], strides = [1, 1]} : vector<2x2xf32> to vector<2x1xf32>
    %201 = vector.extract_strided_slice %22 {offsets = [0, 0], sizes = [1, 128], strides = [1, 1]} : vector<2x128xf32> to vector<1x128xf32>
    %202 = vector.broadcast %200 : vector<2x1xf32> to vector<2x128xf32>
    %203 = vector.broadcast %201 : vector<1x128xf32> to vector<2x128xf32>
    %204 = arith.mulf %202, %203 : vector<2x128xf32>
    %205 = vector.extract_strided_slice %188 {offsets = [0, 1], sizes = [2, 1], strides = [1, 1]} : vector<2x2xf32> to vector<2x1xf32>
    %206 = vector.extract_strided_slice %22 {offsets = [1, 0], sizes = [1, 128], strides = [1, 1]} : vector<2x128xf32> to vector<1x128xf32>
    %207 = vector.broadcast %205 : vector<2x1xf32> to vector<2x128xf32>
    %208 = vector.broadcast %206 : vector<1x128xf32> to vector<2x128xf32>
    %209 = arith.mulf %207, %208 : vector<2x128xf32>
    %210 = arith.addf %204, %209 : vector<2x128xf32>
    %211 = vector.extract_strided_slice %34 {offsets = [0, 0], sizes = [16, 1], strides = [1, 1]} : vector<16x2xf32> to vector<16x1xf32>
    %212 = vector.extract_strided_slice %199 {offsets = [0, 0], sizes = [1, 128], strides = [1, 1]} : vector<2x128xf32> to vector<1x128xf32>
    %213 = vector.broadcast %211 : vector<16x1xf32> to vector<16x128xf32>
    %214 = vector.broadcast %212 : vector<1x128xf32> to vector<16x128xf32>
    %215 = arith.mulf %213, %214 : vector<16x128xf32>
    %216 = vector.extract_strided_slice %34 {offsets = [0, 1], sizes = [16, 1], strides = [1, 1]} : vector<16x2xf32> to vector<16x1xf32>
    %217 = vector.extract_strided_slice %199 {offsets = [1, 0], sizes = [1, 128], strides = [1, 1]} : vector<2x128xf32> to vector<1x128xf32>
    %218 = vector.broadcast %216 : vector<16x1xf32> to vector<16x128xf32>
    %219 = vector.broadcast %217 : vector<1x128xf32> to vector<16x128xf32>
    %220 = arith.mulf %218, %219 : vector<16x128xf32>
    %221 = arith.addf %215, %220 : vector<16x128xf32>
    %cst_53 = arith.constant dense<0.000000e+00> : vector<16x128xf32>
    %222 = tpu.matmul %38, %221, %cst_53 {dimension_numbers = #tpu.dot_dimension_numbers<[1], [0], [0], [1], [0, 0, 1, 1], [], []>} : vector<16x16xf32>, vector<16x128xf32>, vector<16x128xf32> -> vector<16x128xf32>
    %223 = vector.extract_strided_slice %34 {offsets = [0, 0], sizes = [16, 1], strides = [1, 1]} : vector<16x2xf32> to vector<16x1xf32>
    %224 = vector.extract_strided_slice %210 {offsets = [0, 0], sizes = [1, 128], strides = [1, 1]} : vector<2x128xf32> to vector<1x128xf32>
    %225 = vector.broadcast %223 : vector<16x1xf32> to vector<16x128xf32>
    %226 = vector.broadcast %224 : vector<1x128xf32> to vector<16x128xf32>
    %227 = arith.mulf %225, %226 : vector<16x128xf32>
    %228 = vector.extract_strided_slice %34 {offsets = [0, 1], sizes = [16, 1], strides = [1, 1]} : vector<16x2xf32> to vector<16x1xf32>
    %229 = vector.extract_strided_slice %210 {offsets = [1, 0], sizes = [1, 128], strides = [1, 1]} : vector<2x128xf32> to vector<1x128xf32>
    %230 = vector.broadcast %228 : vector<16x1xf32> to vector<16x128xf32>
    %231 = vector.broadcast %229 : vector<1x128xf32> to vector<16x128xf32>
    %232 = arith.mulf %230, %231 : vector<16x128xf32>
    %233 = arith.addf %227, %232 : vector<16x128xf32>
    %cst_54 = arith.constant dense<0.000000e+00> : vector<16x128xf32>
    %234 = tpu.matmul %38, %233, %cst_54 {dimension_numbers = #tpu.dot_dimension_numbers<[1], [0], [0], [1], [0, 0, 1, 1], [], []>} : vector<16x16xf32>, vector<16x128xf32>, vector<16x128xf32> -> vector<16x128xf32>
    %c1_55 = arith.constant 1 : index
    %c0_56 = arith.constant 0 : index
    %c0_57 = arith.constant 0 : index
    %235 = vector.load %arg1[%c1_55, %c0_56, %c0_57] : memref<4x16x2xf32, #tpu.memory_space<vmem>>, vector<1x16x2xf32>
    %236 = vector.shape_cast %235 : vector<1x16x2xf32> to vector<16x2xf32>
    %c1_58 = arith.constant 1 : index
    %c0_59 = arith.constant 0 : index
    %c0_60 = arith.constant 0 : index
    %237 = vector.load %arg2[%c1_58, %c0_59, %c0_60] : memref<4x2x16xf32, #tpu.memory_space<vmem>>, vector<1x2x16xf32>
    %238 = vector.shape_cast %237 : vector<1x2x16xf32> to vector<2x16xf32>
    %c1_61 = arith.constant 1 : index
    %c0_62 = arith.constant 0 : index
    %c0_63 = arith.constant 0 : index
    %239 = vector.load %arg0[%c1_61, %c0_62, %c0_63] : memref<4x16x16xf32, #tpu.memory_space<vmem>>, vector<1x16x16xf32>
    %240 = vector.shape_cast %239 : vector<1x16x16xf32> to vector<16x16xf32>
    %241 = vector.broadcast %23 : vector<1x2xf32> to vector<16x2xf32>
    %242 = arith.mulf %236, %241 : vector<16x2xf32>
    %cst_64 = arith.constant dense<0.000000e+00> : vector<16xf32>
    %243 = vector.multi_reduction <add>, %242, %cst_64 [1] : vector<16x2xf32> to vector<16xf32>
    %244 = vector.shape_cast %243 : vector<16xf32> to vector<16x1xf32>
    %245 = vector.broadcast %27 : vector<1x1xf32> to vector<16x1xf32>
    %246 = arith.divf %244, %245 : vector<16x1xf32>
    %cst_65 = arith.constant 0.000000e+00 : f32
    %247 = vector.broadcast %cst_65 : f32 to vector<2x2xf32>
    %cst_66 = arith.constant dense<0xFF800000> : vector<1xf32>
    %248 = vector.multi_reduction <maximumf>, %246, %cst_66 [0] : vector<16x1xf32> to vector<1xf32>
    %249 = vector.shape_cast %248 : vector<1xf32> to vector<1x1xf32>
    %250 = vector.broadcast %249 : vector<1x1xf32> to vector<16x1xf32>
    %251 = arith.cmpf oeq, %246, %250 : vector<16x1xf32>
    %cst_67 = arith.constant 1.600000e+01 : f32
    %252 = vector.broadcast %cst_67 : f32 to vector<16x1xf32>
    %253 = arith.select %251, %29, %252 : vector<16x1xi1>, vector<16x1xf32>
    %cst_68 = arith.constant dense<0x7F800000> : vector<1xf32>
    %254 = vector.multi_reduction <minimumf>, %253, %cst_68 [0] : vector<16x1xf32> to vector<1xf32>
    %255 = vector.shape_cast %254 : vector<1xf32> to vector<1x1xf32>
    %256 = vector.broadcast %255 : vector<1x1xf32> to vector<1x16xf32>
    %257 = arith.cmpf oeq, %31, %256 : vector<1x16xf32>
    %258 = arith.extui %257 : vector<1x16xi1> to vector<1x16xi32>
    %259 = arith.sitofp %258 : vector<1x16xi32> to vector<1x16xf32>
    %260 = vector.broadcast %259 : vector<1x16xf32> to vector<2x16xf32>
    %261 = arith.mulf %238, %260 : vector<2x16xf32>
    %cst_69 = arith.constant dense<0.000000e+00> : vector<2xf32>
    %262 = vector.multi_reduction <add>, %261, %cst_69 [1] : vector<2x16xf32> to vector<2xf32>
    %263 = vector.shape_cast %262 : vector<2xf32> to vector<2x1xf32>
    %264 = vector.broadcast %249 : vector<1x1xf32> to vector<2x1xf32>
    %265 = arith.mulf %263, %264 : vector<2x1xf32>
    %c0_i32_70 = arith.constant 0 : i32
    %266 = vector.broadcast %c0_i32_70 : i32 to vector<2x2xi32>
    %267 = arith.cmpi eq, %32, %266 : vector<2x2xi32>
    %cst_71 = arith.constant 0.000000e+00 : f32
    %268 = vector.shape_cast %265 : vector<2x1xf32> to vector<2x1xf32>
    %269 = vector.broadcast %268 : vector<2x1xf32> to vector<2x2xf32>
    %270 = vector.broadcast %cst_71 : f32 to vector<2x2xf32>
    %271 = arith.select %267, %269, %270 : vector<2x2xi1>, vector<2x2xf32>
    %272 = arith.addf %247, %271 : vector<2x2xf32>
    %273 = vector.broadcast %255 : vector<1x1xf32> to vector<16x1xf32>
    %274 = arith.cmpf oeq, %29, %273 : vector<16x1xf32>
    %cst_72 = arith.constant -1.000000e+30 : f32
    %275 = vector.broadcast %cst_72 : f32 to vector<16x1xf32>
    %276 = arith.select %274, %275, %246 : vector<16x1xi1>, vector<16x1xf32>
    %cst_73 = arith.constant dense<0xFF800000> : vector<1xf32>
    %277 = vector.multi_reduction <maximumf>, %276, %cst_73 [0] : vector<16x1xf32> to vector<1xf32>
    %278 = vector.shape_cast %277 : vector<1xf32> to vector<1x1xf32>
    %279 = vector.broadcast %278 : vector<1x1xf32> to vector<16x1xf32>
    %280 = arith.cmpf oeq, %276, %279 : vector<16x1xf32>
    %cst_74 = arith.constant 1.600000e+01 : f32
    %281 = vector.broadcast %cst_74 : f32 to vector<16x1xf32>
    %282 = arith.select %280, %29, %281 : vector<16x1xi1>, vector<16x1xf32>
    %cst_75 = arith.constant dense<0x7F800000> : vector<1xf32>
    %283 = vector.multi_reduction <minimumf>, %282, %cst_75 [0] : vector<16x1xf32> to vector<1xf32>
    %284 = vector.shape_cast %283 : vector<1xf32> to vector<1x1xf32>
    %285 = vector.broadcast %284 : vector<1x1xf32> to vector<1x16xf32>
    %286 = arith.cmpf oeq, %31, %285 : vector<1x16xf32>
    %287 = arith.extui %286 : vector<1x16xi1> to vector<1x16xi32>
    %288 = arith.sitofp %287 : vector<1x16xi32> to vector<1x16xf32>
    %289 = vector.broadcast %288 : vector<1x16xf32> to vector<2x16xf32>
    %290 = arith.mulf %238, %289 : vector<2x16xf32>
    %cst_76 = arith.constant dense<0.000000e+00> : vector<2xf32>
    %291 = vector.multi_reduction <add>, %290, %cst_76 [1] : vector<2x16xf32> to vector<2xf32>
    %292 = vector.shape_cast %291 : vector<2xf32> to vector<2x1xf32>
    %293 = vector.broadcast %278 : vector<1x1xf32> to vector<2x1xf32>
    %294 = arith.mulf %292, %293 : vector<2x1xf32>
    %c1_i32_77 = arith.constant 1 : i32
    %295 = vector.broadcast %c1_i32_77 : i32 to vector<2x2xi32>
    %296 = arith.cmpi eq, %32, %295 : vector<2x2xi32>
    %cst_78 = arith.constant 0.000000e+00 : f32
    %297 = vector.shape_cast %294 : vector<2x1xf32> to vector<2x1xf32>
    %298 = vector.broadcast %297 : vector<2x1xf32> to vector<2x2xf32>
    %299 = vector.broadcast %cst_78 : f32 to vector<2x2xf32>
    %300 = arith.select %296, %298, %299 : vector<2x2xi1>, vector<2x2xf32>
    %301 = arith.addf %272, %300 : vector<2x2xf32>
    %302 = vector.extract_strided_slice %1 {offsets = [0, 0], sizes = [2, 1], strides = [1, 1]} : vector<2x2xf32> to vector<2x1xf32>
    %303 = vector.extract_strided_slice %301 {offsets = [0, 0], sizes = [1, 2], strides = [1, 1]} : vector<2x2xf32> to vector<1x2xf32>
    %304 = vector.broadcast %302 : vector<2x1xf32> to vector<2x2xf32>
    %305 = vector.broadcast %303 : vector<1x2xf32> to vector<2x2xf32>
    %306 = arith.mulf %304, %305 : vector<2x2xf32>
    %307 = vector.extract_strided_slice %1 {offsets = [0, 1], sizes = [2, 1], strides = [1, 1]} : vector<2x2xf32> to vector<2x1xf32>
    %308 = vector.extract_strided_slice %301 {offsets = [1, 0], sizes = [1, 2], strides = [1, 1]} : vector<2x2xf32> to vector<1x2xf32>
    %309 = vector.broadcast %307 : vector<2x1xf32> to vector<2x2xf32>
    %310 = vector.broadcast %308 : vector<1x2xf32> to vector<2x2xf32>
    %311 = arith.mulf %309, %310 : vector<2x2xf32>
    %312 = arith.addf %306, %311 : vector<2x2xf32>
    %313 = vector.extract_strided_slice %3 {offsets = [0, 0], sizes = [2, 1], strides = [1, 1]} : vector<2x2xf32> to vector<2x1xf32>
    %314 = vector.extract_strided_slice %188 {offsets = [0, 0], sizes = [1, 2], strides = [1, 1]} : vector<2x2xf32> to vector<1x2xf32>
    %315 = vector.broadcast %313 : vector<2x1xf32> to vector<2x2xf32>
    %316 = vector.broadcast %314 : vector<1x2xf32> to vector<2x2xf32>
    %317 = arith.mulf %315, %316 : vector<2x2xf32>
    %318 = vector.extract_strided_slice %3 {offsets = [0, 1], sizes = [2, 1], strides = [1, 1]} : vector<2x2xf32> to vector<2x1xf32>
    %319 = vector.extract_strided_slice %188 {offsets = [1, 0], sizes = [1, 2], strides = [1, 1]} : vector<2x2xf32> to vector<1x2xf32>
    %320 = vector.broadcast %318 : vector<2x1xf32> to vector<2x2xf32>
    %321 = vector.broadcast %319 : vector<1x2xf32> to vector<2x2xf32>
    %322 = arith.mulf %320, %321 : vector<2x2xf32>
    %323 = arith.addf %317, %322 : vector<2x2xf32>
    %324 = arith.addf %312, %323 : vector<2x2xf32>
    %325 = arith.addf %324, %13 : vector<2x2xf32>
    %326 = arith.negf %325 : vector<2x2xf32>
    %327 = math.exp %326 : vector<2x2xf32>
    %cst_79 = arith.constant 1.000000e+00 : f32
    %328 = vector.broadcast %cst_79 : f32 to vector<2x2xf32>
    %329 = arith.addf %328, %327 : vector<2x2xf32>
    %330 = arith.divf %328, %329 : vector<2x2xf32>
    %331 = vector.extract_strided_slice %5 {offsets = [0, 0], sizes = [2, 1], strides = [1, 1]} : vector<2x2xf32> to vector<2x1xf32>
    %332 = vector.extract_strided_slice %301 {offsets = [0, 0], sizes = [1, 2], strides = [1, 1]} : vector<2x2xf32> to vector<1x2xf32>
    %333 = vector.broadcast %331 : vector<2x1xf32> to vector<2x2xf32>
    %334 = vector.broadcast %332 : vector<1x2xf32> to vector<2x2xf32>
    %335 = arith.mulf %333, %334 : vector<2x2xf32>
    %336 = vector.extract_strided_slice %5 {offsets = [0, 1], sizes = [2, 1], strides = [1, 1]} : vector<2x2xf32> to vector<2x1xf32>
    %337 = vector.extract_strided_slice %301 {offsets = [1, 0], sizes = [1, 2], strides = [1, 1]} : vector<2x2xf32> to vector<1x2xf32>
    %338 = vector.broadcast %336 : vector<2x1xf32> to vector<2x2xf32>
    %339 = vector.broadcast %337 : vector<1x2xf32> to vector<2x2xf32>
    %340 = arith.mulf %338, %339 : vector<2x2xf32>
    %341 = arith.addf %335, %340 : vector<2x2xf32>
    %342 = vector.extract_strided_slice %7 {offsets = [0, 0], sizes = [2, 1], strides = [1, 1]} : vector<2x2xf32> to vector<2x1xf32>
    %343 = vector.extract_strided_slice %188 {offsets = [0, 0], sizes = [1, 2], strides = [1, 1]} : vector<2x2xf32> to vector<1x2xf32>
    %344 = vector.broadcast %342 : vector<2x1xf32> to vector<2x2xf32>
    %345 = vector.broadcast %343 : vector<1x2xf32> to vector<2x2xf32>
    %346 = arith.mulf %344, %345 : vector<2x2xf32>
    %347 = vector.extract_strided_slice %7 {offsets = [0, 1], sizes = [2, 1], strides = [1, 1]} : vector<2x2xf32> to vector<2x1xf32>
    %348 = vector.extract_strided_slice %188 {offsets = [1, 0], sizes = [1, 2], strides = [1, 1]} : vector<2x2xf32> to vector<1x2xf32>
    %349 = vector.broadcast %347 : vector<2x1xf32> to vector<2x2xf32>
    %350 = vector.broadcast %348 : vector<1x2xf32> to vector<2x2xf32>
    %351 = arith.mulf %349, %350 : vector<2x2xf32>
    %352 = arith.addf %346, %351 : vector<2x2xf32>
    %353 = arith.addf %341, %352 : vector<2x2xf32>
    %354 = arith.addf %353, %15 : vector<2x2xf32>
    %355 = arith.negf %354 : vector<2x2xf32>
    %356 = math.exp %355 : vector<2x2xf32>
    %cst_80 = arith.constant 1.000000e+00 : f32
    %357 = vector.broadcast %cst_80 : f32 to vector<2x2xf32>
    %358 = arith.addf %357, %356 : vector<2x2xf32>
    %359 = arith.divf %357, %358 : vector<2x2xf32>
    %360 = vector.extract_strided_slice %9 {offsets = [0, 0], sizes = [2, 1], strides = [1, 1]} : vector<2x2xf32> to vector<2x1xf32>
    %361 = vector.extract_strided_slice %301 {offsets = [0, 0], sizes = [1, 2], strides = [1, 1]} : vector<2x2xf32> to vector<1x2xf32>
    %362 = vector.broadcast %360 : vector<2x1xf32> to vector<2x2xf32>
    %363 = vector.broadcast %361 : vector<1x2xf32> to vector<2x2xf32>
    %364 = arith.mulf %362, %363 : vector<2x2xf32>
    %365 = vector.extract_strided_slice %9 {offsets = [0, 1], sizes = [2, 1], strides = [1, 1]} : vector<2x2xf32> to vector<2x1xf32>
    %366 = vector.extract_strided_slice %301 {offsets = [1, 0], sizes = [1, 2], strides = [1, 1]} : vector<2x2xf32> to vector<1x2xf32>
    %367 = vector.broadcast %365 : vector<2x1xf32> to vector<2x2xf32>
    %368 = vector.broadcast %366 : vector<1x2xf32> to vector<2x2xf32>
    %369 = arith.mulf %367, %368 : vector<2x2xf32>
    %370 = arith.addf %364, %369 : vector<2x2xf32>
    %371 = arith.mulf %359, %188 : vector<2x2xf32>
    %372 = vector.extract_strided_slice %11 {offsets = [0, 0], sizes = [2, 1], strides = [1, 1]} : vector<2x2xf32> to vector<2x1xf32>
    %373 = vector.extract_strided_slice %371 {offsets = [0, 0], sizes = [1, 2], strides = [1, 1]} : vector<2x2xf32> to vector<1x2xf32>
    %374 = vector.broadcast %372 : vector<2x1xf32> to vector<2x2xf32>
    %375 = vector.broadcast %373 : vector<1x2xf32> to vector<2x2xf32>
    %376 = arith.mulf %374, %375 : vector<2x2xf32>
    %377 = vector.extract_strided_slice %11 {offsets = [0, 1], sizes = [2, 1], strides = [1, 1]} : vector<2x2xf32> to vector<2x1xf32>
    %378 = vector.extract_strided_slice %371 {offsets = [1, 0], sizes = [1, 2], strides = [1, 1]} : vector<2x2xf32> to vector<1x2xf32>
    %379 = vector.broadcast %377 : vector<2x1xf32> to vector<2x2xf32>
    %380 = vector.broadcast %378 : vector<1x2xf32> to vector<2x2xf32>
    %381 = arith.mulf %379, %380 : vector<2x2xf32>
    %382 = arith.addf %376, %381 : vector<2x2xf32>
    %383 = arith.addf %370, %382 : vector<2x2xf32>
    %384 = arith.addf %383, %17 : vector<2x2xf32>
    %385 = math.tanh %384 : vector<2x2xf32>
    %cst_81 = arith.constant 1.000000e+00 : f32
    %386 = vector.broadcast %cst_81 : f32 to vector<2x2xf32>
    %387 = arith.subf %386, %330 : vector<2x2xf32>
    %388 = arith.mulf %387, %188 : vector<2x2xf32>
    %389 = arith.mulf %330, %385 : vector<2x2xf32>
    %390 = arith.addf %388, %389 : vector<2x2xf32>
    %391 = vector.extract_strided_slice %390 {offsets = [0, 0], sizes = [2, 1], strides = [1, 1]} : vector<2x2xf32> to vector<2x1xf32>
    %392 = vector.extract_strided_slice %21 {offsets = [0, 0], sizes = [1, 128], strides = [1, 1]} : vector<2x128xf32> to vector<1x128xf32>
    %393 = vector.broadcast %391 : vector<2x1xf32> to vector<2x128xf32>
    %394 = vector.broadcast %392 : vector<1x128xf32> to vector<2x128xf32>
    %395 = arith.mulf %393, %394 : vector<2x128xf32>
    %396 = vector.extract_strided_slice %390 {offsets = [0, 1], sizes = [2, 1], strides = [1, 1]} : vector<2x2xf32> to vector<2x1xf32>
    %397 = vector.extract_strided_slice %21 {offsets = [1, 0], sizes = [1, 128], strides = [1, 1]} : vector<2x128xf32> to vector<1x128xf32>
    %398 = vector.broadcast %396 : vector<2x1xf32> to vector<2x128xf32>
    %399 = vector.broadcast %397 : vector<1x128xf32> to vector<2x128xf32>
    %400 = arith.mulf %398, %399 : vector<2x128xf32>
    %401 = arith.addf %395, %400 : vector<2x128xf32>
    %402 = vector.extract_strided_slice %390 {offsets = [0, 0], sizes = [2, 1], strides = [1, 1]} : vector<2x2xf32> to vector<2x1xf32>
    %403 = vector.extract_strided_slice %22 {offsets = [0, 0], sizes = [1, 128], strides = [1, 1]} : vector<2x128xf32> to vector<1x128xf32>
    %404 = vector.broadcast %402 : vector<2x1xf32> to vector<2x128xf32>
    %405 = vector.broadcast %403 : vector<1x128xf32> to vector<2x128xf32>
    %406 = arith.mulf %404, %405 : vector<2x128xf32>
    %407 = vector.extract_strided_slice %390 {offsets = [0, 1], sizes = [2, 1], strides = [1, 1]} : vector<2x2xf32> to vector<2x1xf32>
    %408 = vector.extract_strided_slice %22 {offsets = [1, 0], sizes = [1, 128], strides = [1, 1]} : vector<2x128xf32> to vector<1x128xf32>
    %409 = vector.broadcast %407 : vector<2x1xf32> to vector<2x128xf32>
    %410 = vector.broadcast %408 : vector<1x128xf32> to vector<2x128xf32>
    %411 = arith.mulf %409, %410 : vector<2x128xf32>
    %412 = arith.addf %406, %411 : vector<2x128xf32>
    %413 = vector.extract_strided_slice %236 {offsets = [0, 0], sizes = [16, 1], strides = [1, 1]} : vector<16x2xf32> to vector<16x1xf32>
    %414 = vector.extract_strided_slice %401 {offsets = [0, 0], sizes = [1, 128], strides = [1, 1]} : vector<2x128xf32> to vector<1x128xf32>
    %415 = vector.broadcast %413 : vector<16x1xf32> to vector<16x128xf32>
    %416 = vector.broadcast %414 : vector<1x128xf32> to vector<16x128xf32>
    %417 = arith.mulf %415, %416 : vector<16x128xf32>
    %418 = vector.extract_strided_slice %236 {offsets = [0, 1], sizes = [16, 1], strides = [1, 1]} : vector<16x2xf32> to vector<16x1xf32>
    %419 = vector.extract_strided_slice %401 {offsets = [1, 0], sizes = [1, 128], strides = [1, 1]} : vector<2x128xf32> to vector<1x128xf32>
    %420 = vector.broadcast %418 : vector<16x1xf32> to vector<16x128xf32>
    %421 = vector.broadcast %419 : vector<1x128xf32> to vector<16x128xf32>
    %422 = arith.mulf %420, %421 : vector<16x128xf32>
    %423 = arith.addf %417, %422 : vector<16x128xf32>
    %cst_82 = arith.constant dense<0.000000e+00> : vector<16x128xf32>
    %424 = tpu.matmul %240, %423, %cst_82 {dimension_numbers = #tpu.dot_dimension_numbers<[1], [0], [0], [1], [0, 0, 1, 1], [], []>} : vector<16x16xf32>, vector<16x128xf32>, vector<16x128xf32> -> vector<16x128xf32>
    %425 = vector.extract_strided_slice %236 {offsets = [0, 0], sizes = [16, 1], strides = [1, 1]} : vector<16x2xf32> to vector<16x1xf32>
    %426 = vector.extract_strided_slice %412 {offsets = [0, 0], sizes = [1, 128], strides = [1, 1]} : vector<2x128xf32> to vector<1x128xf32>
    %427 = vector.broadcast %425 : vector<16x1xf32> to vector<16x128xf32>
    %428 = vector.broadcast %426 : vector<1x128xf32> to vector<16x128xf32>
    %429 = arith.mulf %427, %428 : vector<16x128xf32>
    %430 = vector.extract_strided_slice %236 {offsets = [0, 1], sizes = [16, 1], strides = [1, 1]} : vector<16x2xf32> to vector<16x1xf32>
    %431 = vector.extract_strided_slice %412 {offsets = [1, 0], sizes = [1, 128], strides = [1, 1]} : vector<2x128xf32> to vector<1x128xf32>
    %432 = vector.broadcast %430 : vector<16x1xf32> to vector<16x128xf32>
    %433 = vector.broadcast %431 : vector<1x128xf32> to vector<16x128xf32>
    %434 = arith.mulf %432, %433 : vector<16x128xf32>
    %435 = arith.addf %429, %434 : vector<16x128xf32>
    %cst_83 = arith.constant dense<0.000000e+00> : vector<16x128xf32>
    %436 = tpu.matmul %240, %435, %cst_83 {dimension_numbers = #tpu.dot_dimension_numbers<[1], [0], [0], [1], [0, 0, 1, 1], [], []>} : vector<16x16xf32>, vector<16x128xf32>, vector<16x128xf32> -> vector<16x128xf32>
    %c2_84 = arith.constant 2 : index
    %c0_85 = arith.constant 0 : index
    %c0_86 = arith.constant 0 : index
    %437 = vector.load %arg1[%c2_84, %c0_85, %c0_86] : memref<4x16x2xf32, #tpu.memory_space<vmem>>, vector<1x16x2xf32>
    %438 = vector.shape_cast %437 : vector<1x16x2xf32> to vector<16x2xf32>
    %c2_87 = arith.constant 2 : index
    %c0_88 = arith.constant 0 : index
    %c0_89 = arith.constant 0 : index
    %439 = vector.load %arg2[%c2_87, %c0_88, %c0_89] : memref<4x2x16xf32, #tpu.memory_space<vmem>>, vector<1x2x16xf32>
    %440 = vector.shape_cast %439 : vector<1x2x16xf32> to vector<2x16xf32>
    %c2_90 = arith.constant 2 : index
    %c0_91 = arith.constant 0 : index
    %c0_92 = arith.constant 0 : index
    %441 = vector.load %arg0[%c2_90, %c0_91, %c0_92] : memref<4x16x16xf32, #tpu.memory_space<vmem>>, vector<1x16x16xf32>
    %442 = vector.shape_cast %441 : vector<1x16x16xf32> to vector<16x16xf32>
    %443 = vector.broadcast %23 : vector<1x2xf32> to vector<16x2xf32>
    %444 = arith.mulf %438, %443 : vector<16x2xf32>
    %cst_93 = arith.constant dense<0.000000e+00> : vector<16xf32>
    %445 = vector.multi_reduction <add>, %444, %cst_93 [1] : vector<16x2xf32> to vector<16xf32>
    %446 = vector.shape_cast %445 : vector<16xf32> to vector<16x1xf32>
    %447 = vector.broadcast %27 : vector<1x1xf32> to vector<16x1xf32>
    %448 = arith.divf %446, %447 : vector<16x1xf32>
    %cst_94 = arith.constant 0.000000e+00 : f32
    %449 = vector.broadcast %cst_94 : f32 to vector<2x2xf32>
    %cst_95 = arith.constant dense<0xFF800000> : vector<1xf32>
    %450 = vector.multi_reduction <maximumf>, %448, %cst_95 [0] : vector<16x1xf32> to vector<1xf32>
    %451 = vector.shape_cast %450 : vector<1xf32> to vector<1x1xf32>
    %452 = vector.broadcast %451 : vector<1x1xf32> to vector<16x1xf32>
    %453 = arith.cmpf oeq, %448, %452 : vector<16x1xf32>
    %cst_96 = arith.constant 1.600000e+01 : f32
    %454 = vector.broadcast %cst_96 : f32 to vector<16x1xf32>
    %455 = arith.select %453, %29, %454 : vector<16x1xi1>, vector<16x1xf32>
    %cst_97 = arith.constant dense<0x7F800000> : vector<1xf32>
    %456 = vector.multi_reduction <minimumf>, %455, %cst_97 [0] : vector<16x1xf32> to vector<1xf32>
    %457 = vector.shape_cast %456 : vector<1xf32> to vector<1x1xf32>
    %458 = vector.broadcast %457 : vector<1x1xf32> to vector<1x16xf32>
    %459 = arith.cmpf oeq, %31, %458 : vector<1x16xf32>
    %460 = arith.extui %459 : vector<1x16xi1> to vector<1x16xi32>
    %461 = arith.sitofp %460 : vector<1x16xi32> to vector<1x16xf32>
    %462 = vector.broadcast %461 : vector<1x16xf32> to vector<2x16xf32>
    %463 = arith.mulf %440, %462 : vector<2x16xf32>
    %cst_98 = arith.constant dense<0.000000e+00> : vector<2xf32>
    %464 = vector.multi_reduction <add>, %463, %cst_98 [1] : vector<2x16xf32> to vector<2xf32>
    %465 = vector.shape_cast %464 : vector<2xf32> to vector<2x1xf32>
    %466 = vector.broadcast %451 : vector<1x1xf32> to vector<2x1xf32>
    %467 = arith.mulf %465, %466 : vector<2x1xf32>
    %c0_i32_99 = arith.constant 0 : i32
    %468 = vector.broadcast %c0_i32_99 : i32 to vector<2x2xi32>
    %469 = arith.cmpi eq, %32, %468 : vector<2x2xi32>
    %cst_100 = arith.constant 0.000000e+00 : f32
    %470 = vector.shape_cast %467 : vector<2x1xf32> to vector<2x1xf32>
    %471 = vector.broadcast %470 : vector<2x1xf32> to vector<2x2xf32>
    %472 = vector.broadcast %cst_100 : f32 to vector<2x2xf32>
    %473 = arith.select %469, %471, %472 : vector<2x2xi1>, vector<2x2xf32>
    %474 = arith.addf %449, %473 : vector<2x2xf32>
    %475 = vector.broadcast %457 : vector<1x1xf32> to vector<16x1xf32>
    %476 = arith.cmpf oeq, %29, %475 : vector<16x1xf32>
    %cst_101 = arith.constant -1.000000e+30 : f32
    %477 = vector.broadcast %cst_101 : f32 to vector<16x1xf32>
    %478 = arith.select %476, %477, %448 : vector<16x1xi1>, vector<16x1xf32>
    %cst_102 = arith.constant dense<0xFF800000> : vector<1xf32>
    %479 = vector.multi_reduction <maximumf>, %478, %cst_102 [0] : vector<16x1xf32> to vector<1xf32>
    %480 = vector.shape_cast %479 : vector<1xf32> to vector<1x1xf32>
    %481 = vector.broadcast %480 : vector<1x1xf32> to vector<16x1xf32>
    %482 = arith.cmpf oeq, %478, %481 : vector<16x1xf32>
    %cst_103 = arith.constant 1.600000e+01 : f32
    %483 = vector.broadcast %cst_103 : f32 to vector<16x1xf32>
    %484 = arith.select %482, %29, %483 : vector<16x1xi1>, vector<16x1xf32>
    %cst_104 = arith.constant dense<0x7F800000> : vector<1xf32>
    %485 = vector.multi_reduction <minimumf>, %484, %cst_104 [0] : vector<16x1xf32> to vector<1xf32>
    %486 = vector.shape_cast %485 : vector<1xf32> to vector<1x1xf32>
    %487 = vector.broadcast %486 : vector<1x1xf32> to vector<1x16xf32>
    %488 = arith.cmpf oeq, %31, %487 : vector<1x16xf32>
    %489 = arith.extui %488 : vector<1x16xi1> to vector<1x16xi32>
    %490 = arith.sitofp %489 : vector<1x16xi32> to vector<1x16xf32>
    %491 = vector.broadcast %490 : vector<1x16xf32> to vector<2x16xf32>
    %492 = arith.mulf %440, %491 : vector<2x16xf32>
    %cst_105 = arith.constant dense<0.000000e+00> : vector<2xf32>
    %493 = vector.multi_reduction <add>, %492, %cst_105 [1] : vector<2x16xf32> to vector<2xf32>
    %494 = vector.shape_cast %493 : vector<2xf32> to vector<2x1xf32>
    %495 = vector.broadcast %480 : vector<1x1xf32> to vector<2x1xf32>
    %496 = arith.mulf %494, %495 : vector<2x1xf32>
    %c1_i32_106 = arith.constant 1 : i32
    %497 = vector.broadcast %c1_i32_106 : i32 to vector<2x2xi32>
    %498 = arith.cmpi eq, %32, %497 : vector<2x2xi32>
    %cst_107 = arith.constant 0.000000e+00 : f32
    %499 = vector.shape_cast %496 : vector<2x1xf32> to vector<2x1xf32>
    %500 = vector.broadcast %499 : vector<2x1xf32> to vector<2x2xf32>
    %501 = vector.broadcast %cst_107 : f32 to vector<2x2xf32>
    %502 = arith.select %498, %500, %501 : vector<2x2xi1>, vector<2x2xf32>
    %503 = arith.addf %474, %502 : vector<2x2xf32>
    %504 = vector.extract_strided_slice %1 {offsets = [0, 0], sizes = [2, 1], strides = [1, 1]} : vector<2x2xf32> to vector<2x1xf32>
    %505 = vector.extract_strided_slice %503 {offsets = [0, 0], sizes = [1, 2], strides = [1, 1]} : vector<2x2xf32> to vector<1x2xf32>
    %506 = vector.broadcast %504 : vector<2x1xf32> to vector<2x2xf32>
    %507 = vector.broadcast %505 : vector<1x2xf32> to vector<2x2xf32>
    %508 = arith.mulf %506, %507 : vector<2x2xf32>
    %509 = vector.extract_strided_slice %1 {offsets = [0, 1], sizes = [2, 1], strides = [1, 1]} : vector<2x2xf32> to vector<2x1xf32>
    %510 = vector.extract_strided_slice %503 {offsets = [1, 0], sizes = [1, 2], strides = [1, 1]} : vector<2x2xf32> to vector<1x2xf32>
    %511 = vector.broadcast %509 : vector<2x1xf32> to vector<2x2xf32>
    %512 = vector.broadcast %510 : vector<1x2xf32> to vector<2x2xf32>
    %513 = arith.mulf %511, %512 : vector<2x2xf32>
    %514 = arith.addf %508, %513 : vector<2x2xf32>
    %515 = vector.extract_strided_slice %3 {offsets = [0, 0], sizes = [2, 1], strides = [1, 1]} : vector<2x2xf32> to vector<2x1xf32>
    %516 = vector.extract_strided_slice %390 {offsets = [0, 0], sizes = [1, 2], strides = [1, 1]} : vector<2x2xf32> to vector<1x2xf32>
    %517 = vector.broadcast %515 : vector<2x1xf32> to vector<2x2xf32>
    %518 = vector.broadcast %516 : vector<1x2xf32> to vector<2x2xf32>
    %519 = arith.mulf %517, %518 : vector<2x2xf32>
    %520 = vector.extract_strided_slice %3 {offsets = [0, 1], sizes = [2, 1], strides = [1, 1]} : vector<2x2xf32> to vector<2x1xf32>
    %521 = vector.extract_strided_slice %390 {offsets = [1, 0], sizes = [1, 2], strides = [1, 1]} : vector<2x2xf32> to vector<1x2xf32>
    %522 = vector.broadcast %520 : vector<2x1xf32> to vector<2x2xf32>
    %523 = vector.broadcast %521 : vector<1x2xf32> to vector<2x2xf32>
    %524 = arith.mulf %522, %523 : vector<2x2xf32>
    %525 = arith.addf %519, %524 : vector<2x2xf32>
    %526 = arith.addf %514, %525 : vector<2x2xf32>
    %527 = arith.addf %526, %13 : vector<2x2xf32>
    %528 = arith.negf %527 : vector<2x2xf32>
    %529 = math.exp %528 : vector<2x2xf32>
    %cst_108 = arith.constant 1.000000e+00 : f32
    %530 = vector.broadcast %cst_108 : f32 to vector<2x2xf32>
    %531 = arith.addf %530, %529 : vector<2x2xf32>
    %532 = arith.divf %530, %531 : vector<2x2xf32>
    %533 = vector.extract_strided_slice %5 {offsets = [0, 0], sizes = [2, 1], strides = [1, 1]} : vector<2x2xf32> to vector<2x1xf32>
    %534 = vector.extract_strided_slice %503 {offsets = [0, 0], sizes = [1, 2], strides = [1, 1]} : vector<2x2xf32> to vector<1x2xf32>
    %535 = vector.broadcast %533 : vector<2x1xf32> to vector<2x2xf32>
    %536 = vector.broadcast %534 : vector<1x2xf32> to vector<2x2xf32>
    %537 = arith.mulf %535, %536 : vector<2x2xf32>
    %538 = vector.extract_strided_slice %5 {offsets = [0, 1], sizes = [2, 1], strides = [1, 1]} : vector<2x2xf32> to vector<2x1xf32>
    %539 = vector.extract_strided_slice %503 {offsets = [1, 0], sizes = [1, 2], strides = [1, 1]} : vector<2x2xf32> to vector<1x2xf32>
    %540 = vector.broadcast %538 : vector<2x1xf32> to vector<2x2xf32>
    %541 = vector.broadcast %539 : vector<1x2xf32> to vector<2x2xf32>
    %542 = arith.mulf %540, %541 : vector<2x2xf32>
    %543 = arith.addf %537, %542 : vector<2x2xf32>
    %544 = vector.extract_strided_slice %7 {offsets = [0, 0], sizes = [2, 1], strides = [1, 1]} : vector<2x2xf32> to vector<2x1xf32>
    %545 = vector.extract_strided_slice %390 {offsets = [0, 0], sizes = [1, 2], strides = [1, 1]} : vector<2x2xf32> to vector<1x2xf32>
    %546 = vector.broadcast %544 : vector<2x1xf32> to vector<2x2xf32>
    %547 = vector.broadcast %545 : vector<1x2xf32> to vector<2x2xf32>
    %548 = arith.mulf %546, %547 : vector<2x2xf32>
    %549 = vector.extract_strided_slice %7 {offsets = [0, 1], sizes = [2, 1], strides = [1, 1]} : vector<2x2xf32> to vector<2x1xf32>
    %550 = vector.extract_strided_slice %390 {offsets = [1, 0], sizes = [1, 2], strides = [1, 1]} : vector<2x2xf32> to vector<1x2xf32>
    %551 = vector.broadcast %549 : vector<2x1xf32> to vector<2x2xf32>
    %552 = vector.broadcast %550 : vector<1x2xf32> to vector<2x2xf32>
    %553 = arith.mulf %551, %552 : vector<2x2xf32>
    %554 = arith.addf %548, %553 : vector<2x2xf32>
    %555 = arith.addf %543, %554 : vector<2x2xf32>
    %556 = arith.addf %555, %15 : vector<2x2xf32>
    %557 = arith.negf %556 : vector<2x2xf32>
    %558 = math.exp %557 : vector<2x2xf32>
    %cst_109 = arith.constant 1.000000e+00 : f32
    %559 = vector.broadcast %cst_109 : f32 to vector<2x2xf32>
    %560 = arith.addf %559, %558 : vector<2x2xf32>
    %561 = arith.divf %559, %560 : vector<2x2xf32>
    %562 = vector.extract_strided_slice %9 {offsets = [0, 0], sizes = [2, 1], strides = [1, 1]} : vector<2x2xf32> to vector<2x1xf32>
    %563 = vector.extract_strided_slice %503 {offsets = [0, 0], sizes = [1, 2], strides = [1, 1]} : vector<2x2xf32> to vector<1x2xf32>
    %564 = vector.broadcast %562 : vector<2x1xf32> to vector<2x2xf32>
    %565 = vector.broadcast %563 : vector<1x2xf32> to vector<2x2xf32>
    %566 = arith.mulf %564, %565 : vector<2x2xf32>
    %567 = vector.extract_strided_slice %9 {offsets = [0, 1], sizes = [2, 1], strides = [1, 1]} : vector<2x2xf32> to vector<2x1xf32>
    %568 = vector.extract_strided_slice %503 {offsets = [1, 0], sizes = [1, 2], strides = [1, 1]} : vector<2x2xf32> to vector<1x2xf32>
    %569 = vector.broadcast %567 : vector<2x1xf32> to vector<2x2xf32>
    %570 = vector.broadcast %568 : vector<1x2xf32> to vector<2x2xf32>
    %571 = arith.mulf %569, %570 : vector<2x2xf32>
    %572 = arith.addf %566, %571 : vector<2x2xf32>
    %573 = arith.mulf %561, %390 : vector<2x2xf32>
    %574 = vector.extract_strided_slice %11 {offsets = [0, 0], sizes = [2, 1], strides = [1, 1]} : vector<2x2xf32> to vector<2x1xf32>
    %575 = vector.extract_strided_slice %573 {offsets = [0, 0], sizes = [1, 2], strides = [1, 1]} : vector<2x2xf32> to vector<1x2xf32>
    %576 = vector.broadcast %574 : vector<2x1xf32> to vector<2x2xf32>
    %577 = vector.broadcast %575 : vector<1x2xf32> to vector<2x2xf32>
    %578 = arith.mulf %576, %577 : vector<2x2xf32>
    %579 = vector.extract_strided_slice %11 {offsets = [0, 1], sizes = [2, 1], strides = [1, 1]} : vector<2x2xf32> to vector<2x1xf32>
    %580 = vector.extract_strided_slice %573 {offsets = [1, 0], sizes = [1, 2], strides = [1, 1]} : vector<2x2xf32> to vector<1x2xf32>
    %581 = vector.broadcast %579 : vector<2x1xf32> to vector<2x2xf32>
    %582 = vector.broadcast %580 : vector<1x2xf32> to vector<2x2xf32>
    %583 = arith.mulf %581, %582 : vector<2x2xf32>
    %584 = arith.addf %578, %583 : vector<2x2xf32>
    %585 = arith.addf %572, %584 : vector<2x2xf32>
    %586 = arith.addf %585, %17 : vector<2x2xf32>
    %587 = math.tanh %586 : vector<2x2xf32>
    %cst_110 = arith.constant 1.000000e+00 : f32
    %588 = vector.broadcast %cst_110 : f32 to vector<2x2xf32>
    %589 = arith.subf %588, %532 : vector<2x2xf32>
    %590 = arith.mulf %589, %390 : vector<2x2xf32>
    %591 = arith.mulf %532, %587 : vector<2x2xf32>
    %592 = arith.addf %590, %591 : vector<2x2xf32>
    %593 = vector.extract_strided_slice %592 {offsets = [0, 0], sizes = [2, 1], strides = [1, 1]} : vector<2x2xf32> to vector<2x1xf32>
    %594 = vector.extract_strided_slice %21 {offsets = [0, 0], sizes = [1, 128], strides = [1, 1]} : vector<2x128xf32> to vector<1x128xf32>
    %595 = vector.broadcast %593 : vector<2x1xf32> to vector<2x128xf32>
    %596 = vector.broadcast %594 : vector<1x128xf32> to vector<2x128xf32>
    %597 = arith.mulf %595, %596 : vector<2x128xf32>
    %598 = vector.extract_strided_slice %592 {offsets = [0, 1], sizes = [2, 1], strides = [1, 1]} : vector<2x2xf32> to vector<2x1xf32>
    %599 = vector.extract_strided_slice %21 {offsets = [1, 0], sizes = [1, 128], strides = [1, 1]} : vector<2x128xf32> to vector<1x128xf32>
    %600 = vector.broadcast %598 : vector<2x1xf32> to vector<2x128xf32>
    %601 = vector.broadcast %599 : vector<1x128xf32> to vector<2x128xf32>
    %602 = arith.mulf %600, %601 : vector<2x128xf32>
    %603 = arith.addf %597, %602 : vector<2x128xf32>
    %604 = vector.extract_strided_slice %592 {offsets = [0, 0], sizes = [2, 1], strides = [1, 1]} : vector<2x2xf32> to vector<2x1xf32>
    %605 = vector.extract_strided_slice %22 {offsets = [0, 0], sizes = [1, 128], strides = [1, 1]} : vector<2x128xf32> to vector<1x128xf32>
    %606 = vector.broadcast %604 : vector<2x1xf32> to vector<2x128xf32>
    %607 = vector.broadcast %605 : vector<1x128xf32> to vector<2x128xf32>
    %608 = arith.mulf %606, %607 : vector<2x128xf32>
    %609 = vector.extract_strided_slice %592 {offsets = [0, 1], sizes = [2, 1], strides = [1, 1]} : vector<2x2xf32> to vector<2x1xf32>
    %610 = vector.extract_strided_slice %22 {offsets = [1, 0], sizes = [1, 128], strides = [1, 1]} : vector<2x128xf32> to vector<1x128xf32>
    %611 = vector.broadcast %609 : vector<2x1xf32> to vector<2x128xf32>
    %612 = vector.broadcast %610 : vector<1x128xf32> to vector<2x128xf32>
    %613 = arith.mulf %611, %612 : vector<2x128xf32>
    %614 = arith.addf %608, %613 : vector<2x128xf32>
    %615 = vector.extract_strided_slice %438 {offsets = [0, 0], sizes = [16, 1], strides = [1, 1]} : vector<16x2xf32> to vector<16x1xf32>
    %616 = vector.extract_strided_slice %603 {offsets = [0, 0], sizes = [1, 128], strides = [1, 1]} : vector<2x128xf32> to vector<1x128xf32>
    %617 = vector.broadcast %615 : vector<16x1xf32> to vector<16x128xf32>
    %618 = vector.broadcast %616 : vector<1x128xf32> to vector<16x128xf32>
    %619 = arith.mulf %617, %618 : vector<16x128xf32>
    %620 = vector.extract_strided_slice %438 {offsets = [0, 1], sizes = [16, 1], strides = [1, 1]} : vector<16x2xf32> to vector<16x1xf32>
    %621 = vector.extract_strided_slice %603 {offsets = [1, 0], sizes = [1, 128], strides = [1, 1]} : vector<2x128xf32> to vector<1x128xf32>
    %622 = vector.broadcast %620 : vector<16x1xf32> to vector<16x128xf32>
    %623 = vector.broadcast %621 : vector<1x128xf32> to vector<16x128xf32>
    %624 = arith.mulf %622, %623 : vector<16x128xf32>
    %625 = arith.addf %619, %624 : vector<16x128xf32>
    %cst_111 = arith.constant dense<0.000000e+00> : vector<16x128xf32>
    %626 = tpu.matmul %442, %625, %cst_111 {dimension_numbers = #tpu.dot_dimension_numbers<[1], [0], [0], [1], [0, 0, 1, 1], [], []>} : vector<16x16xf32>, vector<16x128xf32>, vector<16x128xf32> -> vector<16x128xf32>
    %627 = vector.extract_strided_slice %438 {offsets = [0, 0], sizes = [16, 1], strides = [1, 1]} : vector<16x2xf32> to vector<16x1xf32>
    %628 = vector.extract_strided_slice %614 {offsets = [0, 0], sizes = [1, 128], strides = [1, 1]} : vector<2x128xf32> to vector<1x128xf32>
    %629 = vector.broadcast %627 : vector<16x1xf32> to vector<16x128xf32>
    %630 = vector.broadcast %628 : vector<1x128xf32> to vector<16x128xf32>
    %631 = arith.mulf %629, %630 : vector<16x128xf32>
    %632 = vector.extract_strided_slice %438 {offsets = [0, 1], sizes = [16, 1], strides = [1, 1]} : vector<16x2xf32> to vector<16x1xf32>
    %633 = vector.extract_strided_slice %614 {offsets = [1, 0], sizes = [1, 128], strides = [1, 1]} : vector<2x128xf32> to vector<1x128xf32>
    %634 = vector.broadcast %632 : vector<16x1xf32> to vector<16x128xf32>
    %635 = vector.broadcast %633 : vector<1x128xf32> to vector<16x128xf32>
    %636 = arith.mulf %634, %635 : vector<16x128xf32>
    %637 = arith.addf %631, %636 : vector<16x128xf32>
    %cst_112 = arith.constant dense<0.000000e+00> : vector<16x128xf32>
    %638 = tpu.matmul %442, %637, %cst_112 {dimension_numbers = #tpu.dot_dimension_numbers<[1], [0], [0], [1], [0, 0, 1, 1], [], []>} : vector<16x16xf32>, vector<16x128xf32>, vector<16x128xf32> -> vector<16x128xf32>
    %c3_113 = arith.constant 3 : index
    %c0_114 = arith.constant 0 : index
    %c0_115 = arith.constant 0 : index
    %639 = vector.load %arg1[%c3_113, %c0_114, %c0_115] : memref<4x16x2xf32, #tpu.memory_space<vmem>>, vector<1x16x2xf32>
    %640 = vector.shape_cast %639 : vector<1x16x2xf32> to vector<16x2xf32>
    %c3_116 = arith.constant 3 : index
    %c0_117 = arith.constant 0 : index
    %c0_118 = arith.constant 0 : index
    %641 = vector.load %arg2[%c3_116, %c0_117, %c0_118] : memref<4x2x16xf32, #tpu.memory_space<vmem>>, vector<1x2x16xf32>
    %642 = vector.shape_cast %641 : vector<1x2x16xf32> to vector<2x16xf32>
    %c3_119 = arith.constant 3 : index
    %c0_120 = arith.constant 0 : index
    %c0_121 = arith.constant 0 : index
    %643 = vector.load %arg0[%c3_119, %c0_120, %c0_121] : memref<4x16x16xf32, #tpu.memory_space<vmem>>, vector<1x16x16xf32>
    %644 = vector.shape_cast %643 : vector<1x16x16xf32> to vector<16x16xf32>
    %645 = vector.broadcast %23 : vector<1x2xf32> to vector<16x2xf32>
    %646 = arith.mulf %640, %645 : vector<16x2xf32>
    %cst_122 = arith.constant dense<0.000000e+00> : vector<16xf32>
    %647 = vector.multi_reduction <add>, %646, %cst_122 [1] : vector<16x2xf32> to vector<16xf32>
    %648 = vector.shape_cast %647 : vector<16xf32> to vector<16x1xf32>
    %649 = vector.broadcast %27 : vector<1x1xf32> to vector<16x1xf32>
    %650 = arith.divf %648, %649 : vector<16x1xf32>
    %cst_123 = arith.constant 0.000000e+00 : f32
    %651 = vector.broadcast %cst_123 : f32 to vector<2x2xf32>
    %cst_124 = arith.constant dense<0xFF800000> : vector<1xf32>
    %652 = vector.multi_reduction <maximumf>, %650, %cst_124 [0] : vector<16x1xf32> to vector<1xf32>
    %653 = vector.shape_cast %652 : vector<1xf32> to vector<1x1xf32>
    %654 = vector.broadcast %653 : vector<1x1xf32> to vector<16x1xf32>
    %655 = arith.cmpf oeq, %650, %654 : vector<16x1xf32>
    %cst_125 = arith.constant 1.600000e+01 : f32
    %656 = vector.broadcast %cst_125 : f32 to vector<16x1xf32>
    %657 = arith.select %655, %29, %656 : vector<16x1xi1>, vector<16x1xf32>
    %cst_126 = arith.constant dense<0x7F800000> : vector<1xf32>
    %658 = vector.multi_reduction <minimumf>, %657, %cst_126 [0] : vector<16x1xf32> to vector<1xf32>
    %659 = vector.shape_cast %658 : vector<1xf32> to vector<1x1xf32>
    %660 = vector.broadcast %659 : vector<1x1xf32> to vector<1x16xf32>
    %661 = arith.cmpf oeq, %31, %660 : vector<1x16xf32>
    %662 = arith.extui %661 : vector<1x16xi1> to vector<1x16xi32>
    %663 = arith.sitofp %662 : vector<1x16xi32> to vector<1x16xf32>
    %664 = vector.broadcast %663 : vector<1x16xf32> to vector<2x16xf32>
    %665 = arith.mulf %642, %664 : vector<2x16xf32>
    %cst_127 = arith.constant dense<0.000000e+00> : vector<2xf32>
    %666 = vector.multi_reduction <add>, %665, %cst_127 [1] : vector<2x16xf32> to vector<2xf32>
    %667 = vector.shape_cast %666 : vector<2xf32> to vector<2x1xf32>
    %668 = vector.broadcast %653 : vector<1x1xf32> to vector<2x1xf32>
    %669 = arith.mulf %667, %668 : vector<2x1xf32>
    %c0_i32_128 = arith.constant 0 : i32
    %670 = vector.broadcast %c0_i32_128 : i32 to vector<2x2xi32>
    %671 = arith.cmpi eq, %32, %670 : vector<2x2xi32>
    %cst_129 = arith.constant 0.000000e+00 : f32
    %672 = vector.shape_cast %669 : vector<2x1xf32> to vector<2x1xf32>
    %673 = vector.broadcast %672 : vector<2x1xf32> to vector<2x2xf32>
    %674 = vector.broadcast %cst_129 : f32 to vector<2x2xf32>
    %675 = arith.select %671, %673, %674 : vector<2x2xi1>, vector<2x2xf32>
    %676 = arith.addf %651, %675 : vector<2x2xf32>
    %677 = vector.broadcast %659 : vector<1x1xf32> to vector<16x1xf32>
    %678 = arith.cmpf oeq, %29, %677 : vector<16x1xf32>
    %cst_130 = arith.constant -1.000000e+30 : f32
    %679 = vector.broadcast %cst_130 : f32 to vector<16x1xf32>
    %680 = arith.select %678, %679, %650 : vector<16x1xi1>, vector<16x1xf32>
    %cst_131 = arith.constant dense<0xFF800000> : vector<1xf32>
    %681 = vector.multi_reduction <maximumf>, %680, %cst_131 [0] : vector<16x1xf32> to vector<1xf32>
    %682 = vector.shape_cast %681 : vector<1xf32> to vector<1x1xf32>
    %683 = vector.broadcast %682 : vector<1x1xf32> to vector<16x1xf32>
    %684 = arith.cmpf oeq, %680, %683 : vector<16x1xf32>
    %cst_132 = arith.constant 1.600000e+01 : f32
    %685 = vector.broadcast %cst_132 : f32 to vector<16x1xf32>
    %686 = arith.select %684, %29, %685 : vector<16x1xi1>, vector<16x1xf32>
    %cst_133 = arith.constant dense<0x7F800000> : vector<1xf32>
    %687 = vector.multi_reduction <minimumf>, %686, %cst_133 [0] : vector<16x1xf32> to vector<1xf32>
    %688 = vector.shape_cast %687 : vector<1xf32> to vector<1x1xf32>
    %689 = vector.broadcast %688 : vector<1x1xf32> to vector<1x16xf32>
    %690 = arith.cmpf oeq, %31, %689 : vector<1x16xf32>
    %691 = arith.extui %690 : vector<1x16xi1> to vector<1x16xi32>
    %692 = arith.sitofp %691 : vector<1x16xi32> to vector<1x16xf32>
    %693 = vector.broadcast %692 : vector<1x16xf32> to vector<2x16xf32>
    %694 = arith.mulf %642, %693 : vector<2x16xf32>
    %cst_134 = arith.constant dense<0.000000e+00> : vector<2xf32>
    %695 = vector.multi_reduction <add>, %694, %cst_134 [1] : vector<2x16xf32> to vector<2xf32>
    %696 = vector.shape_cast %695 : vector<2xf32> to vector<2x1xf32>
    %697 = vector.broadcast %682 : vector<1x1xf32> to vector<2x1xf32>
    %698 = arith.mulf %696, %697 : vector<2x1xf32>
    %c1_i32_135 = arith.constant 1 : i32
    %699 = vector.broadcast %c1_i32_135 : i32 to vector<2x2xi32>
    %700 = arith.cmpi eq, %32, %699 : vector<2x2xi32>
    %cst_136 = arith.constant 0.000000e+00 : f32
    %701 = vector.shape_cast %698 : vector<2x1xf32> to vector<2x1xf32>
    %702 = vector.broadcast %701 : vector<2x1xf32> to vector<2x2xf32>
    %703 = vector.broadcast %cst_136 : f32 to vector<2x2xf32>
    %704 = arith.select %700, %702, %703 : vector<2x2xi1>, vector<2x2xf32>
    %705 = arith.addf %676, %704 : vector<2x2xf32>
    %706 = vector.extract_strided_slice %1 {offsets = [0, 0], sizes = [2, 1], strides = [1, 1]} : vector<2x2xf32> to vector<2x1xf32>
    %707 = vector.extract_strided_slice %705 {offsets = [0, 0], sizes = [1, 2], strides = [1, 1]} : vector<2x2xf32> to vector<1x2xf32>
    %708 = vector.broadcast %706 : vector<2x1xf32> to vector<2x2xf32>
    %709 = vector.broadcast %707 : vector<1x2xf32> to vector<2x2xf32>
    %710 = arith.mulf %708, %709 : vector<2x2xf32>
    %711 = vector.extract_strided_slice %1 {offsets = [0, 1], sizes = [2, 1], strides = [1, 1]} : vector<2x2xf32> to vector<2x1xf32>
    %712 = vector.extract_strided_slice %705 {offsets = [1, 0], sizes = [1, 2], strides = [1, 1]} : vector<2x2xf32> to vector<1x2xf32>
    %713 = vector.broadcast %711 : vector<2x1xf32> to vector<2x2xf32>
    %714 = vector.broadcast %712 : vector<1x2xf32> to vector<2x2xf32>
    %715 = arith.mulf %713, %714 : vector<2x2xf32>
    %716 = arith.addf %710, %715 : vector<2x2xf32>
    %717 = vector.extract_strided_slice %3 {offsets = [0, 0], sizes = [2, 1], strides = [1, 1]} : vector<2x2xf32> to vector<2x1xf32>
    %718 = vector.extract_strided_slice %592 {offsets = [0, 0], sizes = [1, 2], strides = [1, 1]} : vector<2x2xf32> to vector<1x2xf32>
    %719 = vector.broadcast %717 : vector<2x1xf32> to vector<2x2xf32>
    %720 = vector.broadcast %718 : vector<1x2xf32> to vector<2x2xf32>
    %721 = arith.mulf %719, %720 : vector<2x2xf32>
    %722 = vector.extract_strided_slice %3 {offsets = [0, 1], sizes = [2, 1], strides = [1, 1]} : vector<2x2xf32> to vector<2x1xf32>
    %723 = vector.extract_strided_slice %592 {offsets = [1, 0], sizes = [1, 2], strides = [1, 1]} : vector<2x2xf32> to vector<1x2xf32>
    %724 = vector.broadcast %722 : vector<2x1xf32> to vector<2x2xf32>
    %725 = vector.broadcast %723 : vector<1x2xf32> to vector<2x2xf32>
    %726 = arith.mulf %724, %725 : vector<2x2xf32>
    %727 = arith.addf %721, %726 : vector<2x2xf32>
    %728 = arith.addf %716, %727 : vector<2x2xf32>
    %729 = arith.addf %728, %13 : vector<2x2xf32>
    %730 = arith.negf %729 : vector<2x2xf32>
    %731 = math.exp %730 : vector<2x2xf32>
    %cst_137 = arith.constant 1.000000e+00 : f32
    %732 = vector.broadcast %cst_137 : f32 to vector<2x2xf32>
    %733 = arith.addf %732, %731 : vector<2x2xf32>
    %734 = arith.divf %732, %733 : vector<2x2xf32>
    %735 = vector.extract_strided_slice %5 {offsets = [0, 0], sizes = [2, 1], strides = [1, 1]} : vector<2x2xf32> to vector<2x1xf32>
    %736 = vector.extract_strided_slice %705 {offsets = [0, 0], sizes = [1, 2], strides = [1, 1]} : vector<2x2xf32> to vector<1x2xf32>
    %737 = vector.broadcast %735 : vector<2x1xf32> to vector<2x2xf32>
    %738 = vector.broadcast %736 : vector<1x2xf32> to vector<2x2xf32>
    %739 = arith.mulf %737, %738 : vector<2x2xf32>
    %740 = vector.extract_strided_slice %5 {offsets = [0, 1], sizes = [2, 1], strides = [1, 1]} : vector<2x2xf32> to vector<2x1xf32>
    %741 = vector.extract_strided_slice %705 {offsets = [1, 0], sizes = [1, 2], strides = [1, 1]} : vector<2x2xf32> to vector<1x2xf32>
    %742 = vector.broadcast %740 : vector<2x1xf32> to vector<2x2xf32>
    %743 = vector.broadcast %741 : vector<1x2xf32> to vector<2x2xf32>
    %744 = arith.mulf %742, %743 : vector<2x2xf32>
    %745 = arith.addf %739, %744 : vector<2x2xf32>
    %746 = vector.extract_strided_slice %7 {offsets = [0, 0], sizes = [2, 1], strides = [1, 1]} : vector<2x2xf32> to vector<2x1xf32>
    %747 = vector.extract_strided_slice %592 {offsets = [0, 0], sizes = [1, 2], strides = [1, 1]} : vector<2x2xf32> to vector<1x2xf32>
    %748 = vector.broadcast %746 : vector<2x1xf32> to vector<2x2xf32>
    %749 = vector.broadcast %747 : vector<1x2xf32> to vector<2x2xf32>
    %750 = arith.mulf %748, %749 : vector<2x2xf32>
    %751 = vector.extract_strided_slice %7 {offsets = [0, 1], sizes = [2, 1], strides = [1, 1]} : vector<2x2xf32> to vector<2x1xf32>
    %752 = vector.extract_strided_slice %592 {offsets = [1, 0], sizes = [1, 2], strides = [1, 1]} : vector<2x2xf32> to vector<1x2xf32>
    %753 = vector.broadcast %751 : vector<2x1xf32> to vector<2x2xf32>
    %754 = vector.broadcast %752 : vector<1x2xf32> to vector<2x2xf32>
    %755 = arith.mulf %753, %754 : vector<2x2xf32>
    %756 = arith.addf %750, %755 : vector<2x2xf32>
    %757 = arith.addf %745, %756 : vector<2x2xf32>
    %758 = arith.addf %757, %15 : vector<2x2xf32>
    %759 = arith.negf %758 : vector<2x2xf32>
    %760 = math.exp %759 : vector<2x2xf32>
    %cst_138 = arith.constant 1.000000e+00 : f32
    %761 = vector.broadcast %cst_138 : f32 to vector<2x2xf32>
    %762 = arith.addf %761, %760 : vector<2x2xf32>
    %763 = arith.divf %761, %762 : vector<2x2xf32>
    %764 = vector.extract_strided_slice %9 {offsets = [0, 0], sizes = [2, 1], strides = [1, 1]} : vector<2x2xf32> to vector<2x1xf32>
    %765 = vector.extract_strided_slice %705 {offsets = [0, 0], sizes = [1, 2], strides = [1, 1]} : vector<2x2xf32> to vector<1x2xf32>
    %766 = vector.broadcast %764 : vector<2x1xf32> to vector<2x2xf32>
    %767 = vector.broadcast %765 : vector<1x2xf32> to vector<2x2xf32>
    %768 = arith.mulf %766, %767 : vector<2x2xf32>
    %769 = vector.extract_strided_slice %9 {offsets = [0, 1], sizes = [2, 1], strides = [1, 1]} : vector<2x2xf32> to vector<2x1xf32>
    %770 = vector.extract_strided_slice %705 {offsets = [1, 0], sizes = [1, 2], strides = [1, 1]} : vector<2x2xf32> to vector<1x2xf32>
    %771 = vector.broadcast %769 : vector<2x1xf32> to vector<2x2xf32>
    %772 = vector.broadcast %770 : vector<1x2xf32> to vector<2x2xf32>
    %773 = arith.mulf %771, %772 : vector<2x2xf32>
    %774 = arith.addf %768, %773 : vector<2x2xf32>
    %775 = arith.mulf %763, %592 : vector<2x2xf32>
    %776 = vector.extract_strided_slice %11 {offsets = [0, 0], sizes = [2, 1], strides = [1, 1]} : vector<2x2xf32> to vector<2x1xf32>
    %777 = vector.extract_strided_slice %775 {offsets = [0, 0], sizes = [1, 2], strides = [1, 1]} : vector<2x2xf32> to vector<1x2xf32>
    %778 = vector.broadcast %776 : vector<2x1xf32> to vector<2x2xf32>
    %779 = vector.broadcast %777 : vector<1x2xf32> to vector<2x2xf32>
    %780 = arith.mulf %778, %779 : vector<2x2xf32>
    %781 = vector.extract_strided_slice %11 {offsets = [0, 1], sizes = [2, 1], strides = [1, 1]} : vector<2x2xf32> to vector<2x1xf32>
    %782 = vector.extract_strided_slice %775 {offsets = [1, 0], sizes = [1, 2], strides = [1, 1]} : vector<2x2xf32> to vector<1x2xf32>
    %783 = vector.broadcast %781 : vector<2x1xf32> to vector<2x2xf32>
    %784 = vector.broadcast %782 : vector<1x2xf32> to vector<2x2xf32>
    %785 = arith.mulf %783, %784 : vector<2x2xf32>
    %786 = arith.addf %780, %785 : vector<2x2xf32>
    %787 = arith.addf %774, %786 : vector<2x2xf32>
    %788 = arith.addf %787, %17 : vector<2x2xf32>
    %789 = math.tanh %788 : vector<2x2xf32>
    %cst_139 = arith.constant 1.000000e+00 : f32
    %790 = vector.broadcast %cst_139 : f32 to vector<2x2xf32>
    %791 = arith.subf %790, %734 : vector<2x2xf32>
    %792 = arith.mulf %791, %592 : vector<2x2xf32>
    %793 = arith.mulf %734, %789 : vector<2x2xf32>
    %794 = arith.addf %792, %793 : vector<2x2xf32>
    %795 = vector.extract_strided_slice %794 {offsets = [0, 0], sizes = [2, 1], strides = [1, 1]} : vector<2x2xf32> to vector<2x1xf32>
    %796 = vector.extract_strided_slice %21 {offsets = [0, 0], sizes = [1, 128], strides = [1, 1]} : vector<2x128xf32> to vector<1x128xf32>
    %797 = vector.broadcast %795 : vector<2x1xf32> to vector<2x128xf32>
    %798 = vector.broadcast %796 : vector<1x128xf32> to vector<2x128xf32>
    %799 = arith.mulf %797, %798 : vector<2x128xf32>
    %800 = vector.extract_strided_slice %794 {offsets = [0, 1], sizes = [2, 1], strides = [1, 1]} : vector<2x2xf32> to vector<2x1xf32>
    %801 = vector.extract_strided_slice %21 {offsets = [1, 0], sizes = [1, 128], strides = [1, 1]} : vector<2x128xf32> to vector<1x128xf32>
    %802 = vector.broadcast %800 : vector<2x1xf32> to vector<2x128xf32>
    %803 = vector.broadcast %801 : vector<1x128xf32> to vector<2x128xf32>
    %804 = arith.mulf %802, %803 : vector<2x128xf32>
    %805 = arith.addf %799, %804 : vector<2x128xf32>
    %806 = vector.extract_strided_slice %794 {offsets = [0, 0], sizes = [2, 1], strides = [1, 1]} : vector<2x2xf32> to vector<2x1xf32>
    %807 = vector.extract_strided_slice %22 {offsets = [0, 0], sizes = [1, 128], strides = [1, 1]} : vector<2x128xf32> to vector<1x128xf32>
    %808 = vector.broadcast %806 : vector<2x1xf32> to vector<2x128xf32>
    %809 = vector.broadcast %807 : vector<1x128xf32> to vector<2x128xf32>
    %810 = arith.mulf %808, %809 : vector<2x128xf32>
    %811 = vector.extract_strided_slice %794 {offsets = [0, 1], sizes = [2, 1], strides = [1, 1]} : vector<2x2xf32> to vector<2x1xf32>
    %812 = vector.extract_strided_slice %22 {offsets = [1, 0], sizes = [1, 128], strides = [1, 1]} : vector<2x128xf32> to vector<1x128xf32>
    %813 = vector.broadcast %811 : vector<2x1xf32> to vector<2x128xf32>
    %814 = vector.broadcast %812 : vector<1x128xf32> to vector<2x128xf32>
    %815 = arith.mulf %813, %814 : vector<2x128xf32>
    %816 = arith.addf %810, %815 : vector<2x128xf32>
    %817 = vector.extract_strided_slice %640 {offsets = [0, 0], sizes = [16, 1], strides = [1, 1]} : vector<16x2xf32> to vector<16x1xf32>
    %818 = vector.extract_strided_slice %805 {offsets = [0, 0], sizes = [1, 128], strides = [1, 1]} : vector<2x128xf32> to vector<1x128xf32>
    %819 = vector.broadcast %817 : vector<16x1xf32> to vector<16x128xf32>
    %820 = vector.broadcast %818 : vector<1x128xf32> to vector<16x128xf32>
    %821 = arith.mulf %819, %820 : vector<16x128xf32>
    %822 = vector.extract_strided_slice %640 {offsets = [0, 1], sizes = [16, 1], strides = [1, 1]} : vector<16x2xf32> to vector<16x1xf32>
    %823 = vector.extract_strided_slice %805 {offsets = [1, 0], sizes = [1, 128], strides = [1, 1]} : vector<2x128xf32> to vector<1x128xf32>
    %824 = vector.broadcast %822 : vector<16x1xf32> to vector<16x128xf32>
    %825 = vector.broadcast %823 : vector<1x128xf32> to vector<16x128xf32>
    %826 = arith.mulf %824, %825 : vector<16x128xf32>
    %827 = arith.addf %821, %826 : vector<16x128xf32>
    %cst_140 = arith.constant dense<0.000000e+00> : vector<16x128xf32>
    %828 = tpu.matmul %644, %827, %cst_140 {dimension_numbers = #tpu.dot_dimension_numbers<[1], [0], [0], [1], [0, 0, 1, 1], [], []>} : vector<16x16xf32>, vector<16x128xf32>, vector<16x128xf32> -> vector<16x128xf32>
    %829 = vector.extract_strided_slice %640 {offsets = [0, 0], sizes = [16, 1], strides = [1, 1]} : vector<16x2xf32> to vector<16x1xf32>
    %830 = vector.extract_strided_slice %816 {offsets = [0, 0], sizes = [1, 128], strides = [1, 1]} : vector<2x128xf32> to vector<1x128xf32>
    %831 = vector.broadcast %829 : vector<16x1xf32> to vector<16x128xf32>
    %832 = vector.broadcast %830 : vector<1x128xf32> to vector<16x128xf32>
    %833 = arith.mulf %831, %832 : vector<16x128xf32>
    %834 = vector.extract_strided_slice %640 {offsets = [0, 1], sizes = [16, 1], strides = [1, 1]} : vector<16x2xf32> to vector<16x1xf32>
    %835 = vector.extract_strided_slice %816 {offsets = [1, 0], sizes = [1, 128], strides = [1, 1]} : vector<2x128xf32> to vector<1x128xf32>
    %836 = vector.broadcast %834 : vector<16x1xf32> to vector<16x128xf32>
    %837 = vector.broadcast %835 : vector<1x128xf32> to vector<16x128xf32>
    %838 = arith.mulf %836, %837 : vector<16x128xf32>
    %839 = arith.addf %833, %838 : vector<16x128xf32>
    %cst_141 = arith.constant dense<0.000000e+00> : vector<16x128xf32>
    %840 = tpu.matmul %644, %839, %cst_141 {dimension_numbers = #tpu.dot_dimension_numbers<[1], [0], [0], [1], [0, 0, 1, 1], [], []>} : vector<16x16xf32>, vector<16x128xf32>, vector<16x128xf32> -> vector<16x128xf32>
    %841 = tpu.concatenate %222, %424, %626, %828, %234, %436, %638, %840 in 0 : vector<16x128xf32>, vector<16x128xf32>, vector<16x128xf32>, vector<16x128xf32>, vector<16x128xf32>, vector<16x128xf32>, vector<16x128xf32>, vector<16x128xf32> -> vector<128x128xf32>
    %c0_142 = arith.constant 0 : index
    %c0_143 = arith.constant 0 : index
    %842 = vector.load %arg4[%c0_142, %c0_143] : memref<24x2xi32, #tpu.memory_space<vmem>>, vector<24x2xi32>
    %843 = tpu.iota {dimensions = array<i32: 1>} : vector<24x128xi32>
    %844 = vector.extract_strided_slice %842 {offsets = [0, 0], sizes = [24, 1], strides = [1, 1]} : vector<24x2xi32> to vector<24x1xi32>
    %845 = vector.broadcast %844 : vector<24x1xi32> to vector<24x128xi32>
    %846 = arith.cmpi eq, %843, %845 : vector<24x128xi32>
    %847 = vector.extract_strided_slice %842 {offsets = [0, 1], sizes = [24, 1], strides = [1, 1]} : vector<24x2xi32> to vector<24x1xi32>
    %848 = vector.broadcast %847 : vector<24x1xi32> to vector<24x128xi32>
    %849 = arith.cmpi eq, %843, %848 : vector<24x128xi32>
    %850 = arith.ori %846, %849 : vector<24x128xi1>
    %851 = arith.extui %850 : vector<24x128xi1> to vector<24x128xi32>
    %852 = arith.sitofp %851 : vector<24x128xi32> to vector<24x128xf32>
    %cst_144 = arith.constant dense<0.000000e+00> : vector<24x128xf32>
    %853 = tpu.matmul %852, %841, %cst_144 {dimension_numbers = #tpu.dot_dimension_numbers<[1], [0], [0], [1], [0, 0, 1, 1], [], []>} : vector<24x128xf32>, vector<128x128xf32>, vector<24x128xf32> -> vector<24x128xf32>
    %c0_145 = arith.constant 0 : index
    %c0_146 = arith.constant 0 : index
    %854 = vector.load %arg8[%c0_145, %c0_146] : memref<24x128xf32, #tpu.memory_space<vmem>>, vector<24x128xf32>
    tpu.vector_store %arg8[%c0_145, %c0_146], %853 {strides = array<i32>} : memref<24x128xf32, #tpu.memory_space<vmem>>, vector<24x128xf32>,
    %c0_147 = arith.constant 0 : index
    %c0_148 = arith.constant 0 : index
    %855 = vector.load %arg9[%c0_147, %c0_148] : memref<2x2xf32, #tpu.memory_space<vmem>>, vector<2x2xf32>
    tpu.vector_store %arg9[%c0_147, %c0_148], %794 {strides = array<i32>} : memref<2x2xf32, #tpu.memory_space<vmem>>, vector<2x2xf32>,
    return
  }
}

</mosaic_0001>

<bundles_post_ra>
// kernel: evolvegcn_forward.1
= control target key start
LH: loop header
LB: loop body
LE: loop exit
PB: predicated region body
PF: predicated region fallthrough
CT: control target
= control target key end

     0   :  { %vm53_vm0 = vcmask 8192   ;;  %v64_v1 = vlaneseq  ;;  %s2809_s0 = inlined_call_operand.vmem [shape: f32[4,16,16], index: 0, kind: input, shape index: {}]   ;;  %s2810_s1 = inlined_call_operand.vmem [shape: f32[4,16,2], index: 1, kind: input, shape index: {}]   ;;  %s2811_s2 = inlined_call_operand.vmem [shape: f32[4,2,16], index: 2, kind: input, shape index: {}]   ;;  %s2812_s3 = inlined_call_operand.vmem [shape: f32[4,128], index: 3, kind: input, shape index: {}]   ;;  %s2813_s4 = inlined_call_operand.vmem [shape: s32[24,2], index: 4, kind: input, shape index: {}]   ;;  %s2814_s5 = inlined_call_operand.vmem [shape: f32[1,2], index: 5, kind: input, shape index: {}]   ;;  %s2815_s6 = inlined_call_operand.vmem [shape: f32[6,2,2], index: 6, kind: input, shape index: {}]   ;;  %s2816_s7 = inlined_call_operand.vmem [shape: f32[4,2,2], index: 7, kind: input, shape index: {}]   ;;  %s2817_s8 = inlined_call_operand.vmem [shape: f32[24,128], index: 8, kind: output, shape index: {0}]   ;;  %s2818_s9 = inlined_call_operand.hbm [shape: f32[2,2], index: 9, kind: output, shape index: {1}]  }
   0x1   :  { %v51_v0 = vld [vmem:[%s2814_s5] sm:$0x1] }
   0x2   :  { %v52_v2 = vmul.f32 %v51_v0, %v51_v0  ;;  %v2166_v3 = vshrl.u32 %v64_v1, 7 }
   0x3   :  { %15 = vsyncpa [#allocation3], 0  ;;  %v2174_v6 = vld [vmem:[%s2810_s1 + $0x8] sm:$0xff]  ;;  %v2179_v7 = vld [vmem:[%s2810_s1] sm:$0xff]  ;;  %vm85_vm1 = vcmask 15360   ;;  %v2105_v25 = vmov 0  }
   0x4   :  { %v54_v4 = vsel %vm53_vm0, %v52_v2, 0.0  ;;  %v2169_v5 = vsub.s32 0, %v2166_v3  ;;  %v2184_v8 = vld [vmem:[%s2810_s1 + $0x10] sm:$0xff]  ;;  %v2189_v9 = vld [vmem:[%s2810_s1 + $0x18] sm:$0xff]  ;;  %v2205_v15 = vld [vmem:[%s2810_s1 + $0x20] sm:$0xff]  ;;  %2010 = vset.pattern.permute.xlu1 %v2105_v25  ;;  %v2106_v27 = vmov 1   ;;  %v2237_v47 = vcvt.s32.f32 %v2166_v3 }
   0x5   :  { %55 = vadd.xlane.f32.xlu0 %v54_v4  ;;  %v2210_v16 = vld [vmem:[%s2810_s1 + $0x28] sm:$0xff]  ;;  %v2226_v26 = vld [vmem:[%s2815_s6 + $0x4] sm:$0x3]  ;;  %v66_v44 = vadd.s32 8, %v2166_v3  ;;  %v2248_v57 = vand.u32 127, %v64_v1  ;;  %vm121_vm9 = vcmask 123904  }
   0x6   :  { %v2192_v10 = vrot.slane %v51_v0, %v2169_v5  ;;  %2011 = vset.pattern.permute.xlu0 %v2106_v27  ;;  %v74_v4 = vld [vmem:[%s2811_s2] sm:$0x3] }
   0x7   :  { %v2239_v48 = vcvt.s32.f32 %v66_v44  ;;  %v2257_v0 = vcvt.s32.f32 %v2248_v57  ;;  %v1740_v44 = vld [vmem:[%s2815_s6 + $0x6] sm:$0x3] }
   0x8   :  { %v84_v11 = vmul.f32 %v2192_v10, %v2174_v6  ;;  %v83_v12 = vmul.f32 %v2192_v10, %v2179_v7  ;;  %v524_v13 = vmul.f32 %v2184_v8, %v2192_v10  ;;  %v525_v14 = vmul.f32 %v2189_v9, %v2192_v10 }
   0x9   :  { %v885_v21 = vmul.f32 %v2205_v15, %v2192_v10  ;;  %v886_v22 = vmul.f32 %v2210_v16, %v2192_v10 }
   0xa   :  { %v89_v17 = vsel %vm85_vm1, %v84_v11, 0.0  ;;  %v86_v18 = vsel %vm85_vm1, %v83_v12, 0.0  ;;  %v526_v19 = vsel %vm85_vm1, %v524_v13, 0.0  ;;  %v529_v20 = vsel %vm85_vm1, %v525_v14, 0.0 }
   0xb   :  { %90 = vadd.xlane.f32.xlu1 %v89_v17  ;;  %87 = vadd.xlane.f32.xlu0 %v86_v18  ;;  %v887_v23 = vsel %vm85_vm1, %v885_v21, 0.0  ;;  %v890_v24 = vsel %vm85_vm1, %v886_v22, 0.0  ;;  %v2107_v17 = vmov 0.0  }
   0xf   :  { %527 = vadd.xlane.f32.xlu1 %v526_v19  ;;  %530 = vadd.xlane.f32.xlu0 %v529_v20 }
  0x13   :  { %888 = vadd.xlane.f32.xlu1 %v887_v23  ;;  %891 = vadd.xlane.f32.xlu0 %v890_v24 }
  0x24   :  { %212 = vperm.xlu1 %2010, %v2226_v26  }
  0x92   :  { %v56_v28 = vpop.xlane.xlu0 %55 }
  0x93   :  { %2036 = vrsqrt.f32 %v56_v28  ;;  %vm59_vm2 = vcmp.eq.f32.partialorder %v56_v28, inf  ;;  %v62_v31 = vand.u32 2147483648, %v56_v28  ;;  %vm61_vm3 = vcmp.eq.f32.partialorder %v56_v28, 0.0 }
  0x98   :  { %v91_v36 = vpop.xlane.xlu1 %90  ;;  %v88_v37 = vpop.xlane.xlu0 %87 }
  0x9c   :  { %v528_v59 = vpop.xlane.xlu1 %527  ;;  %v531_v60 = vpop.xlane.xlu0 %530 }
  0x9d   :  { %v2037_v29 = vpop.eup %2036 }
  0x9e   :  { %v58_v30 = vmul.f32 %v2037_v29, %v56_v28 }
  0xa0   :  { %v60_v32 = vsel %vm59_vm2, %v56_v28, %v58_v30  ;;  %v889_v13 = vpop.xlane.xlu1 %888  ;;  %v892_v14 = vpop.xlane.xlu0 %891 }
  0xa1   :  { %v63_v33 = vsel %vm61_vm3, %v62_v31, %v60_v32 }
  0xa2   :  { %v95_v34 = vrot.slane %v63_v33, %v2169_v5 }
  0xa4   :  { %2038 = vrcp.f32 %v95_v34 }
  0xae   :  { %v2231_v35 = vpop.eup %2038 }
  0xaf   :  { %v98_v38 = vmul.f32 %v2231_v35, %v91_v36  ;;  %v97_v39 = vmul.f32 %v2231_v35, %v88_v37  ;;  %v2251_v62 = vmul.f32 %v2231_v35, %v528_v59  ;;  %v2254_v63 = vmul.f32 %v2231_v35, %v531_v60 }
  0xb0   :  { %v2269_v21 = vmul.f32 %v2231_v35, %v889_v13  ;;  %v2272_v24 = vmul.f32 %v2231_v35, %v892_v14 }
  0xb1   :  { %v99_v40 = vmax.f32 %v97_v39, %v98_v38  ;;  %v534_v12 = vmax.f32 %v2251_v62, %v2254_v63 }
  0xb2   :  { %v895_v32 = vmax.f32 %v2269_v21, %v2272_v24 }
  0xb3   :  { %v100_v41 = vrot.slane %v99_v40, 4  ;;  %v535_v23 = vrot.slane %v534_v12, 4 }
  0xb4   :  { %v896_v37 = vrot.slane %v895_v32, 4 }
  0xb5   :  { %v101_v42 = vmax.f32 %v99_v40, %v100_v41  ;;  %v536_v31 = vmax.f32 %v534_v12, %v535_v23 }
  0xb7   :  { %v102_v43 = vrot.slane %v101_v42, 2  ;;  %v537_v36 = vrot.slane %v536_v31, 2 }
  0xb9   :  { %v103_v45 = vmax.f32 %v101_v42, %v102_v43  ;;  %v538_v41 = vmax.f32 %v536_v31, %v537_v36  ;;  %v897_v42 = vmax.f32 %v895_v32, %v896_v37  ;;  %v2319_v37 = vld [vmem:[%s2810_s1 + $0x30] sm:$0xff] }
  0xbb   :  { %v104_v46 = vrot.slane %v103_v45, 1 }
  0xbd   :  { %v2241_v49 = vmax.f32 %v103_v45, %v104_v46  ;;  %v539_v46 = vrot.slane %v538_v41, 1 }
  0xbf   :  { %vm106_vm4 = vcmp.eq.f32.partialorder %v97_v39, %v2241_v49  ;;  %vm107_vm5 = vcmp.eq.f32.partialorder %v98_v38, %v2241_v49 }
  0xc0   :  { %v108_v50 = vsel %vm106_vm4, %v2237_v47, 16.0  ;;  %v109_v51 = vsel %vm107_vm5, %v2239_v48, 16.0 }
  0xc1   :  { %v110_v52 = vmin.f32 %v108_v50, %v109_v51  ;;  %v898_v50 = vrot.slane %v897_v42, 2 }
  0xc3   :  { %v111_v53 = vrot.slane %v110_v52, 4 }
  0xc5   :  { %v112_v54 = vmin.f32 %v110_v52, %v111_v53  ;;  %v2286_v52 = vmax.f32 %v538_v41, %v539_v46  ;;  %v899_v53 = vmax.f32 %v897_v42, %v898_v50 }
  0xc7   :  { %v113_v55 = vrot.slane %v112_v54, 2  ;;  %vm541_vm12 = vcmp.eq.f32.partialorder %v2251_v62, %v2286_v52  ;;  %vm542_vm13 = vcmp.eq.f32.partialorder %v2254_v63, %v2286_v52 }
  0xc8   :  { %v543_v60 = vsel %vm541_vm12, %v2237_v47, 16.0 }
  0xc9   :  { %v114_v56 = vmin.f32 %v112_v54, %v113_v55 }
  0xcb   :  { %v115_v58 = vrot.slane %v114_v56, 1 }
  0xcd   :  { %v116_v61 = vmin.f32 %v114_v56, %v115_v58  ;;  %v900_v56 = vrot.slane %v899_v53, 1  ;;  %v32_v58 = vld [vmem:[%s2815_s6] sm:$0x3] }
  0xcf   :  { %vm129_vm6 = vcmp.eq.f32.partialorder %v2237_v47, %v116_v61  ;;  %vm130_vm7 = vcmp.eq.f32.partialorder %v2239_v48, %v116_v61  ;;  %vm117_vm8 = vcmp.eq.f32.partialorder %v2257_v0, %v116_v61  ;;  %v544_v61 = vsel %vm542_vm13, %v2239_v48, 16.0 }
  0xd0   :  { %v131_v2 = vsel %vm129_vm6, -1e+30, %v97_v39  ;;  %v132_v1 = vsel %vm130_vm7, -1e+30, %v98_v38  ;;  %v1746_v18 = vsel %vm117_vm8, 1.0, %v2107_v17  ;;  %v545_v13 = vmin.f32 %v543_v60, %v544_v61 }
  0xd1   :  { %v133_v11 = vmax.f32 %v131_v2, %v132_v1  ;;  %v120_v20 = vmul.f32 %v1746_v18, %v74_v4 }
  0xd2   :  { %v546_v18 = vrot.slane %v545_v13, 4 }
  0xd3   :  { %v134_v19 = vrot.slane %v133_v11, 4  ;;  %v122_v28 = vsel %vm121_vm9, %v120_v20, 0.0 }
  0xd4   :  { %123 = vadd.xlane.f32.xlu1 %v122_v28 }
  0xd5   :  { %v135_v22 = vmax.f32 %v133_v11, %v134_v19  ;;  %v1738_v11 = vld [vmem:[%s2815_s6 + $0x2] sm:$0x3] }
  0xd7   :  { %v136_v29 = vrot.slane %v135_v22, 2 }
  0xd9   :  { %v137_v30 = vmax.f32 %v135_v22, %v136_v29  ;;  %v547_v22 = vmin.f32 %v545_v13, %v546_v18 }
  0xdb   :  { %v138_v33 = vrot.slane %v137_v30, 1  ;;  %v548_v23 = vrot.slane %v547_v22, 2 }
  0xdd   :  { %v2277_v34 = vmax.f32 %v137_v30, %v138_v33  ;;  %v549_v29 = vmin.f32 %v547_v22, %v548_v23 }
  0xdf   :  { %vm140_vm10 = vcmp.eq.f32.partialorder %v131_v2, %v2277_v34  ;;  %vm141_vm11 = vcmp.eq.f32.partialorder %v132_v1, %v2277_v34  ;;  %v2300_v1 = vmax.f32 %v899_v53, %v900_v56  ;;  %v550_v31 = vrot.slane %v549_v29, 1 }
  0xe0   :  { %v142_v38 = vsel %vm140_vm10, %v2237_v47, 16.0  ;;  %v143_v39 = vsel %vm141_vm11, %v2239_v48, 16.0 }
  0xe1   :  { %v144_v40 = vmin.f32 %v142_v38, %v143_v39  ;;  %vm902_vm15 = vcmp.eq.f32.partialorder %v2269_v21, %v2300_v1  ;;  %vm903_vm0 = vcmp.eq.f32.partialorder %v2272_v24, %v2300_v1  ;;  %v2314_v33 = vmin.f32 %v549_v29, %v550_v31 }
  0xe2   :  { %v904_v19 = vsel %vm902_vm15, %v2237_v47, 16.0  ;;  %v905_v20 = vsel %vm903_vm0, %v2239_v48, 16.0  ;;  %v1246_v39 = vmul.f32 %v2319_v37, %v2192_v10  ;;  %vm126_vm15 = vcmp.eq.s32.totalorder %v2248_v57, 0 }
  0xe3   :  { %v145_v43 = vrot.slane %v144_v40, 4  ;;  %vm562_vm2 = vcmp.eq.f32.partialorder %v2237_v47, %v2314_v33  ;;  %vm563_vm3 = vcmp.eq.f32.partialorder %v2239_v48, %v2314_v33  ;;  %vm552_vm11 = vcmp.eq.f32.partialorder %v2257_v0, %v2314_v33 }
  0xe5   :  { %v146_v45 = vmin.f32 %v144_v40, %v145_v43  ;;  %224 = vperm.xlu1 %2010, %v1740_v44   ;;  %v565_v40 = vsel %vm563_vm3, -1e+30, %v2254_v63  ;;  %v1248_v43 = vsel %vm85_vm1, %v1246_v39, 0.0  ;;  %v2341_v63 = vld [vmem:[%s2810_s1 + $0x38] sm:$0xff] }
  0xe7   :  { %v147_v51 = vrot.slane %v146_v45, 2 }
  0xe9   :  { %v148_v54 = vmin.f32 %v146_v45, %v147_v51  ;;  %2012 = vset.pattern.permute.xlu1 %v2106_v27 }
  0xea   :  { %229 = vperm.xlu1 %2012, %v1740_v44  }
  0xeb   :  { %v149_v55 = vrot.slane %v148_v54, 1 }
  0xed   :  { %v150_v59 = vmin.f32 %v148_v54, %v149_v55  ;;  %v1247_v54 = vmul.f32 %v2341_v63, %v2192_v10 }
  0xee   :  { %173 = vperm.xlu1 %2012, %v32_v58  }
  0xef   :  { %vm151_vm14 = vcmp.eq.f32.partialorder %v2257_v0, %v150_v59  ;;  %v1251_v59 = vsel %vm85_vm1, %v1247_v54, 0.0 }
  0xf0   :  { %v1747_v2 = vsel %vm151_vm14, 1.0, %v2107_v17  ;;  %vm159_vm14 = vcmp.eq.s32.totalorder %v2248_v57, 1 }
  0xf1   :  { %v154_v12 = vmul.f32 %v1747_v2, %v74_v4  ;;  %v906_v4 = vmin.f32 %v904_v19, %v905_v20  ;;  %v1741_v2 = vld [vmem:[%s2815_s6 + $0x8] sm:$0x3] }
  0xf2   :  { %193 = vperm.xlu1 %2012, %v1738_v11  }
  0xf3   :  { %v155_v14 = vsel %vm121_vm9, %v154_v12, 0.0  ;;  %v907_v28 = vrot.slane %v906_v4, 4  ;;  %v1742_v12 = vld [vmem:[%s2815_s6 + $0xa] sm:$0x3] }
  0xf4   :  { %156 = vadd.xlane.f32.xlu0 %v155_v14 }
  0xf5   :  { %v908_v30 = vmin.f32 %v906_v4, %v907_v28 }
  0xf6   :  { %2013 = vset.pattern.permute.xlu1 %v2105_v25 }
  0xf7   :  { %v909_v32 = vrot.slane %v908_v30, 2 }
  0xf9   :  { %v910_v36 = vmin.f32 %v908_v30, %v909_v32 }
  0xfb   :  { %v911_v38 = vrot.slane %v910_v36, 1 }
  0xfd   :  { %v2329_v41 = vmin.f32 %v910_v36, %v911_v38 }
  0xff   :  { %vm923_vm4 = vcmp.eq.f32.partialorder %v2237_v47, %v2329_v41  ;;  %vm924_vm5 = vcmp.eq.f32.partialorder %v2239_v48, %v2329_v41  ;;  %vm913_vm12 = vcmp.eq.f32.partialorder %v2257_v0, %v2329_v41 }
 0x100   :  { %v925_v45 = vsel %vm923_vm4, -1e+30, %v2269_v21  ;;  %v926_v46 = vsel %vm924_vm5, -1e+30, %v2272_v24  ;;  %v1772_v33 = vsel %vm913_vm12, 1.0, %v2107_v17 }
 0x101   :  { %v927_v50 = vmax.f32 %v925_v45, %v926_v46 }
 0x103   :  { %v928_v53 = vrot.slane %v927_v50, 4 }
 0x105   :  { %v929_v56 = vmax.f32 %v927_v50, %v928_v53 }
 0x107   :  { %v930_v21 = vrot.slane %v929_v56, 2 }
 0x109   :  { %v931_v61 = vmax.f32 %v929_v56, %v930_v21  ;;  %v2386_v56 = vpop.permute.xlu1 %212 }
 0x10a   :  { %217 = vperm.xlu0 %2011, %v2226_v26   ;;  %v564_v26 = vsel %vm562_vm2, -1e+30, %v2251_v62 }
 0x10b   :  { %v566_v42 = vmax.f32 %v564_v26, %v565_v40  ;;  %v932_v10 = vrot.slane %v931_v61, 1 }
 0x10d   :  { %v567_v44 = vrot.slane %v566_v42, 4  ;;  %v2358_v14 = vmax.f32 %v931_v61, %v932_v10 }
 0x10f   :  { %v568_v62 = vmax.f32 %v566_v42, %v567_v44  ;;  %vm934_vm1 = vcmp.eq.f32.partialorder %v925_v45, %v2358_v14  ;;  %vm935_vm8 = vcmp.eq.f32.partialorder %v926_v46, %v2358_v14  ;;  %v1759_v42 = vsel %vm552_vm11, 1.0, %v2107_v17  ;;  %v1769_v46 = vld [vmem:[%s2811_s2 + $0x4] sm:$0x3] }
 0x110   :  { %v936_v19 = vsel %vm934_vm1, %v2237_v47, 16.0  ;;  %v937_v20 = vsel %vm935_vm8, %v2239_v48, 16.0  ;;  %vm1718_vm8 = vcmask 9216  }
 0x111   :  { %v569_v51 = vrot.slane %v568_v62, 2  ;;  %v938_v4 = vmin.f32 %v936_v19, %v937_v20 }
 0x113   :  { %v570_v55 = vmax.f32 %v568_v62, %v569_v51  ;;  %v939_v23 = vrot.slane %v938_v4, 4  ;;  %v916_v51 = vmul.f32 %v1772_v33, %v1769_v46 }
 0x115   :  { %v571_v60 = vrot.slane %v570_v55, 1  ;;  %v940_v29 = vmin.f32 %v938_v4, %v939_v23  ;;  %v917_v53 = vsel %vm121_vm9, %v916_v51, 0.0 }
 0x116   :  { %1249 = vadd.xlane.f32.xlu1 %v1248_v43 }
 0x117   :  { %v2346_v24 = vmax.f32 %v570_v55, %v571_v60  ;;  %v941_v32 = vrot.slane %v940_v29, 2 }
 0x119   :  { %vm573_vm6 = vcmp.eq.f32.partialorder %v564_v26, %v2346_v24  ;;  %vm574_vm7 = vcmp.eq.f32.partialorder %v565_v40, %v2346_v24  ;;  %v942_v38 = vmin.f32 %v940_v29, %v941_v32  ;;  %v1756_v26 = vld [vmem:[%s2811_s2 + $0x2] sm:$0x3] }
 0x11a   :  { %v576_v13 = vsel %vm574_vm7, %v2239_v48, 16.0  ;;  %v555_v45 = vmul.f32 %v1759_v42, %v1756_v26 }
 0x11b   :  { %v943_v39 = vrot.slane %v942_v38, 1 }
 0x11c   :  { %v556_v50 = vsel %vm121_vm9, %v555_v45, 0.0 }
 0x11d   :  { %v944_v43 = vmin.f32 %v942_v38, %v943_v39 }
 0x11f   :  { %vm945_vm13 = vcmp.eq.f32.partialorder %v2257_v0, %v944_v43 }
 0x120   :  { %v1773_v41 = vsel %vm945_vm13, 1.0, %v2107_v17 }
 0x121   :  { %v948_v54 = vmul.f32 %v1773_v41, %v1769_v46 }
 0x123   :  { %v949_v55 = vsel %vm121_vm9, %v948_v54, 0.0 }
 0x127   :  { %164 = vperm.xlu1 %2013, %v32_v58   ;;  %v575_v58 = vsel %vm573_vm6, %v2237_v47, 16.0 }
 0x129   :  { %1252 = vadd.xlane.f32.xlu0 %v1251_v59 }
 0x12b   :  { %184 = vperm.xlu1 %2013, %v1738_v11   ;;  %v577_v11 = vmin.f32 %v575_v58, %v576_v13  ;;  %v2399_v13 = vsub.s32 1, %v2166_v3 }
 0x12d   :  { %v578_v18 = vrot.slane %v577_v11, 4 }
 0x12f   :  { %244 = vperm.xlu1 %2013, %v1741_v2   ;;  %v579_v22 = vmin.f32 %v577_v11, %v578_v18 }
 0x131   :  { %v580_v28 = vrot.slane %v579_v22, 2 }
 0x133   :  { %257 = vperm.xlu1 %2013, %v1742_v12   ;;  %v581_v30 = vmin.f32 %v579_v22, %v580_v28 }
 0x135   :  { %v582_v31 = vrot.slane %v581_v30, 1 }
 0x137   :  { %2014 = vset.pattern.permute.xlu1 %v2106_v27  ;;  %v583_v36 = vmin.f32 %v581_v30, %v582_v31 }
 0x138   :  { %266 = vperm.xlu1 %2014, %v1742_v12  }
 0x139   :  { %vm584_vm10 = vcmp.eq.f32.partialorder %v2257_v0, %v583_v36  ;;  %v2423_v36 = vld [vmem:[%s2816_s7 + $0x2] sm:$0x3] }
 0x13a   :  { %v1760_v40 = vsel %vm584_vm10, 1.0, %v2107_v17  ;;  %vm2109_vm10 = vmmov 0  }
 0x13b   :  { %v587_v44 = vmul.f32 %v1760_v40, %v1756_v26  ;;  %1938 = vmatprep.mubr.msk.f32.mxu0 %vm2109_vm10, %v2107_v17 }
 0x13c   :  { %2015 = vset.pattern.permute.xlu1 %v2105_v25 }
 0x13d   :  { %v588_v62 = vsel %vm121_vm9, %v587_v44, 0.0 }
 0x13f   :  { %249 = vperm.xlu0 %2011, %v1741_v2  }
 0x15c   :  { %589 = vadd.xlane.f32.xlu1 %v588_v62 }
 0x15e   :  { %557 = vadd.xlane.f32.xlu0 %v556_v50 }
 0x161   :  { %v124_v59 = vpop.xlane.xlu1 %123 }
 0x162   :  { %918 = vadd.xlane.f32.xlu0 %v917_v53  ;;  %v125_v61 = vmul.f32 %v124_v59, %v2241_v49  ;;  %v2406_v49 = vld [vmem:[%s2816_s7 + $0x6] sm:$0x3] }
 0x163   :  { %v199_v19 = vrot.slane %v2406_v49, %v2399_v13  ;;  %v190_v22 = vrot.slane %v2406_v49, %v2169_v5 }
 0x164   :  { %v127_v10 = vsel %vm126_vm15, %v125_v61, 0.0 }
 0x165   :  { %v2396_v58 = vpop.permute.xlu1 %224 }
 0x166   :  { %950 = vadd.xlane.f32.xlu0 %v949_v55  ;;  %v227_v29 = vmul.f32 %v2396_v58, %v190_v22 }
 0x169   :  { %v2412_v20 = vpop.permute.xlu1 %229 }
 0x16a   :  { %v232_v28 = vmul.f32 %v2412_v20, %v199_v19 }
 0x16c   :  { %v233_v31 = vadd.f32 %v232_v28, %v227_v29 }
 0x16d   :  { %v2425_v38 = vpop.permute.xlu1 %173 }
 0x171   :  { %v2428_v26 = vpop.permute.xlu1 %193 }
 0x172   :  { %v200_v33 = vmul.f32 %v199_v19, %v2428_v26 }
 0x181   :  { %v157_v60 = vpop.xlane.xlu0 %156 }
 0x182   :  { %v158_v21 = vmul.f32 %v157_v60, %v2277_v34 }
 0x184   :  { %v160_v2 = vsel %vm159_vm14, %v158_v21, 0.0  ;;  %v2443_v21 = vld [vmem:[%s2816_s7] sm:$0x3] }
 0x185   :  { %v161_v12 = vadd.f32 %v160_v2, %v127_v10 }
 0x187   :  { %v170_v34 = vrot.slane %v161_v12, %v2169_v5  ;;  %v179_v11 = vrot.slane %v161_v12, %v2399_v13 }
 0x189   :  { %v2408_v18 = vpop.permute.xlu0 %217  ;;  %v215_v4 = vmul.f32 %v2386_v56, %v170_v34  ;;  %v180_v51 = vmul.f32 %v179_v11, %v2425_v38 }
 0x18a   :  { %v220_v23 = vmul.f32 %v2408_v18, %v179_v11 }
 0x18c   :  { %v221_v30 = vadd.f32 %v220_v23, %v215_v4 }
 0x18e   :  { %v234_v32 = vadd.f32 %v233_v31, %v221_v30 }
 0x190   :  { %v235_v39 = vadd.f32 %v2423_v36, %v234_v32 }
 0x192   :  { %v1749_v40 = vmul.f32 -1.442695, %v235_v39 }
 0x194   :  { %2040 = vpow2.f32 %v1749_v40 }
 0x19e   :  { %v2041_v45 = vpop.eup %2040 }
 0x19f   :  { %v239_v62 = vadd.f32 1.0, %v2041_v45 }
 0x1a1   :  { %2042 = vrcp.f32 %v239_v62 }
 0x1a3   :  { %v1250_v42 = vpop.xlane.xlu1 %1249 }
 0x1a4   :  { %v1254_v55 = vmul.f32 %v2231_v35, %v1250_v42 }
 0x1a7   :  { %v2430_v43 = vpop.permute.xlu1 %164 }
 0x1a8   :  { %v171_v50 = vmul.f32 %v170_v34, %v2430_v43 }
 0x1aa   :  { %v181_v53 = vadd.f32 %v180_v51, %v171_v50 }
 0x1ab   :  { %v2432_v44 = vpop.permute.xlu1 %184  ;;  %v2043_v4 = vpop.eup %2042 }
 0x1ac   :  { %v191_v46 = vmul.f32 %v190_v22, %v2432_v44 }
 0x1ae   :  { %v201_v41 = vadd.f32 %v200_v33, %v191_v46 }
 0x1af   :  { %v2445_v2 = vpop.permute.xlu1 %244 }
 0x1b0   :  { %v202_v60 = vadd.f32 %v201_v41, %v181_v53  ;;  %v247_v33 = vmul.f32 %v2445_v2, %v170_v34 }
 0x1b2   :  { %v203_v12 = vadd.f32 %v202_v60, %v2443_v21 }
 0x1b3   :  { %v2448_v28 = vpop.permute.xlu1 %257 }
 0x1b4   :  { %v1748_v23 = vmul.f32 -1.442695, %v203_v12 }
 0x1b6   :  { %v1253_v54 = vpop.xlane.xlu0 %1252  ;;  %2044 = vpow2.f32 %v1748_v23 }
 0x1b7   :  { %v1255_v59 = vmul.f32 %v2231_v35, %v1253_v54  ;;  %v254_v35 = vmul.f32 %v2043_v4, %v2406_v49  ;;  %v2455_v39 = vpop.permute.xlu1 %266 }
 0x1b9   :  { %v1256_v61 = vmax.f32 %v1254_v55, %v1255_v59  ;;  %v272_v40 = vrot.slane %v254_v35, %v2399_v13  ;;  %v263_v62 = vrot.slane %v254_v35, %v2169_v5  ;;  %v2476_v35 = vld [vmem:[%s2811_s2 + $0x6] sm:$0x3] }
 0x1bb   :  { %v1257_v10 = vrot.slane %v1256_v61, 4  ;;  %v273_v51 = vmul.f32 %v272_v40, %v2455_v39  ;;  %v264_v41 = vmul.f32 %v263_v62, %v2448_v28 }
 0x1bd   :  { %v1258_v19 = vmax.f32 %v1256_v61, %v1257_v10  ;;  %v274_v61 = vadd.f32 %v273_v51, %v264_v41 }
 0x1be   :  { %v2451_v31 = vpop.permute.xlu0 %249 }
 0x1bf   :  { %v1259_v22 = vrot.slane %v1258_v19, 2  ;;  %v252_v42 = vmul.f32 %v2451_v31, %v179_v11 }
 0x1c0   :  { %v2045_v10 = vpop.eup %2044 }
 0x1c1   :  { %v1260_v29 = vmax.f32 %v1258_v19, %v1259_v22  ;;  %v253_v54 = vadd.f32 %v252_v42, %v247_v33  ;;  %v2470_v19 = vld [vmem:[%s2816_s7 + $0x4] sm:$0x3]  ;;  %v207_v34 = vadd.f32 1.0, %v2045_v10 }
 0x1c3   :  { %v1261_v30 = vrot.slane %v1260_v29, 1  ;;  %v275_v11 = vadd.f32 %v274_v61, %v253_v54  ;;  %2046 = vrcp.f32 %v207_v34 }
 0x1c5   :  { %v2453_v32 = vmax.f32 %v1260_v29, %v1261_v30  ;;  %v276_v23 = vadd.f32 %v2470_v19, %v275_v11 }
 0x1c7   :  { %vm1263_vm0 = vcmp.eq.f32.partialorder %v1254_v55, %v2453_v32  ;;  %vm1264_vm2 = vcmp.eq.f32.partialorder %v1255_v59, %v2453_v32  ;;  %2048 = vtanh.f32 %v276_v23 }
 0x1c8   :  { %v1265_v45 = vsel %vm1263_vm0, %v2237_v47, 16.0  ;;  %v1266_v46 = vsel %vm1264_vm2, %v2239_v48, 16.0 }
 0x1c9   :  { %v1267_v50 = vmin.f32 %v1265_v45, %v1266_v46 }
 0x1cb   :  { %v1268_v53 = vrot.slane %v1267_v50, 4 }
 0x1cd   :  { %v1269_v60 = vmin.f32 %v1267_v50, %v1268_v53  ;;  %v2047_v51 = vpop.eup %2046 }
 0x1cf   :  { %v1270_v12 = vrot.slane %v1269_v60, 2 }
 0x1d1   :  { %v1271_v22 = vmin.f32 %v1269_v60, %v1270_v12  ;;  %v2049_v53 = vpop.eup %2048  ;;  %v278_v60 = vsub.f32 1.0, %v2047_v51 }
 0x1d2   :  { %v280_v10 = vmul.f32 %v2049_v53, %v2047_v51 }
 0x1d3   :  { %v1272_v4 = vrot.slane %v1271_v22, 1 }
 0x1d5   :  { %v1273_v29 = vmin.f32 %v1271_v22, %v1272_v4 }
 0x1d7   :  { %vm1284_vm3 = vcmp.eq.f32.partialorder %v2237_v47, %v1273_v29  ;;  %vm1285_vm4 = vcmp.eq.f32.partialorder %v2239_v48, %v1273_v29  ;;  %vm1274_vm5 = vcmp.eq.f32.partialorder %v2257_v0, %v1273_v29 }
 0x1d8   :  { %v1286_v30 = vsel %vm1284_vm3, -1e+30, %v1254_v55  ;;  %v1287_v40 = vsel %vm1285_vm4, -1e+30, %v1255_v59  ;;  %v1785_v42 = vsel %vm1274_vm5, 1.0, %v2107_v17  ;;  %v279_v55 = vmul.f32 %v2406_v49, %v278_v60 }
 0x1d9   :  { %v1288_v45 = vmax.f32 %v1286_v30, %v1287_v40  ;;  %v1277_v46 = vmul.f32 %v1785_v42, %v2476_v35 }
 0x1da   :  { %v2491_v34 = vadd.f32 %v280_v10, %v279_v55 }
 0x1db   :  { %v1289_v33 = vrot.slane %v1288_v45, 4  ;;  %v1278_v62 = vsel %vm121_vm9, %v1277_v46, 0.0 }
 0x1dc   :  { %1279 = vadd.xlane.f32.xlu1 %v1278_v62  ;;  %v608_v49 = vrot.slane %v2491_v34, %v2169_v5 }
 0x1dd   :  { %v1290_v50 = vmax.f32 %v1288_v45, %v1289_v33 }
 0x1df   :  { %v1291_v41 = vrot.slane %v1290_v50, 2 }
 0x1e1   :  { %v1292_v54 = vmax.f32 %v1290_v50, %v1291_v41 }
 0x1e3   :  { %v1293_v61 = vrot.slane %v1292_v54, 1 }
 0x1e5   :  { %v2484_v12 = vmax.f32 %v1292_v54, %v1293_v61 }
 0x1e7   :  { %vm1295_vm6 = vcmp.eq.f32.partialorder %v1286_v30, %v2484_v12  ;;  %vm1296_vm7 = vcmp.eq.f32.partialorder %v1287_v40, %v2484_v12  ;;  %v613_v40 = vrot.slane %v2491_v34, %v2399_v13 }
 0x1e8   :  { %v1297_v59 = vsel %vm1295_vm6, %v2237_v47, 16.0  ;;  %v1298_v11 = vsel %vm1296_vm7, %v2239_v48, 16.0 }
 0x1e9   :  { %v1299_v22 = vmin.f32 %v1297_v59, %v1298_v11  ;;  %v590_v23 = vpop.xlane.xlu1 %589  ;;  %v628_v50 = vmul.f32 %v613_v40, %v2412_v20 }
 0x1ea   :  { %v591_v42 = vmul.f32 %v590_v23, %v2346_v24  ;;  %v627_v24 = vmul.f32 %v608_v49, %v2396_v58 }
 0x1eb   :  { %v1300_v4 = vrot.slane %v1299_v22, 4  ;;  %v558_v29 = vpop.xlane.xlu0 %557 }
 0x1ec   :  { %v559_v45 = vmul.f32 %v558_v29, %v2286_v52  ;;  %v592_v47 = vsel %vm159_vm14, %v591_v42, 0.0  ;;  %v629_v61 = vadd.f32 %v628_v50, %v627_v24 }
 0x1ed   :  { %v1301_v30 = vmin.f32 %v1299_v22, %v1300_v4  ;;  %315 = vperm.xlu1 %2015, %v2179_v7   ;;  %v609_v22 = vmul.f32 %v608_v49, %v2432_v44  ;;  %v614_v4 = vmul.f32 %v613_v40, %v2428_v26 }
 0x1ee   :  { %v560_v48 = vsel %vm126_vm15, %v559_v45, 0.0 }
 0x1ef   :  { %v593_v46 = vadd.f32 %v592_v47, %v560_v48  ;;  %v1302_v33 = vrot.slane %v1301_v30, 2 }
 0x1f1   :  { %v597_v52 = vrot.slane %v593_v46, %v2169_v5  ;;  %v602_v62 = vrot.slane %v593_v46, %v2399_v13  ;;  %320 = vperm.xlu1 %2015, %v2174_v6   ;;  %v1303_v51 = vmin.f32 %v1301_v30, %v1302_v33  ;;  %v615_v30 = vadd.f32 %v614_v4, %v609_v22 }
 0x1f3   :  { %v624_v41 = vmul.f32 %v597_v52, %v2386_v56  ;;  %v625_v53 = vmul.f32 %v602_v62, %v2408_v18  ;;  %v1304_v54 = vrot.slane %v1303_v51, 1  ;;  %v598_v10 = vmul.f32 %v597_v52, %v2430_v43 }
 0x1f4   :  { %v603_v55 = vmul.f32 %v602_v62, %v2425_v38  ;;  %v638_v24 = vmul.f32 %v597_v52, %v2445_v2 }
 0x1f5   :  { %v626_v60 = vadd.f32 %v625_v53, %v624_v41  ;;  %2016 = vset.pattern.permute.xlu1 %v2106_v27  ;;  %v1305_v59 = vmin.f32 %v1303_v51, %v1304_v54  ;;  %v639_v51 = vmul.f32 %v602_v62, %v2451_v31  ;;  %v919_v54 = vpop.xlane.xlu0 %918 }
 0x1f6   :  { %334 = vperm.xlu1 %2016, %v2174_v6   ;;  %v604_v29 = vadd.f32 %v603_v55, %v598_v10 }
 0x1f7   :  { %v630_v11 = vadd.f32 %v629_v61, %v626_v60  ;;  %vm1306_vm1 = vcmp.eq.f32.partialorder %v2257_v0, %v1305_v59  ;;  %v640_v10 = vadd.f32 %v639_v51, %v638_v24 }
 0x1f8   :  { %v1786_v42 = vsel %vm1306_vm1, 1.0, %v2107_v17  ;;  %v616_v47 = vadd.f32 %v615_v30, %v604_v29 }
 0x1f9   :  { %v631_v23 = vadd.f32 %v2423_v36, %v630_v11  ;;  %v1309_v6 = vmul.f32 %v1786_v42, %v2476_v35  ;;  %v951_v59 = vpop.xlane.xlu0 %950  ;;  %v920_v11 = vmul.f32 %v919_v54, %v2300_v1  ;;  %v2556_v1 = vld [vmem:[%s2809_s0] sm:$0xff] }
 0x1fa   :  { %2017 = vset.pattern.permute.xlu1 %v2105_v25  ;;  %v617_v0 = vadd.f32 %v616_v47, %v2443_v21  ;;  %v952_v62 = vmul.f32 %v951_v59, %v2358_v14 }
 0x1fb   :  { %v1762_v45 = vmul.f32 -1.442695, %v631_v23  ;;  %677 = vperm.xlu1 %2017, %v2184_v8   ;;  %v1310_v49 = vsel %vm121_vm9, %v1309_v6, 0.0  ;;  %v921_v23 = vsel %vm126_vm15, %v920_v11, 0.0  ;;  %vm345_vm9 = vcmask 130048  }
 0x1fc   :  { %1311 = vadd.xlane.f32.xlu0 %v1310_v49  ;;  %v1761_v40 = vmul.f32 -1.442695, %v617_v0  ;;  %v953_v22 = vsel %vm159_vm14, %v952_v62, 0.0  ;;  %1854 = vmatprep.mubr.msk.f32.mxu1 %vm345_vm9, %v2556_v1 }
 0x1fd   :  { %2050 = vpow2.f32 %v1762_v45  ;;  %v954_v29 = vadd.f32 %v953_v22, %v921_v23 }
 0x1fe   :  { %2052 = vpow2.f32 %v1761_v40 }
 0x1ff   :  { %2018 = vset.pattern.permute.xlu1 %v2106_v27  ;;  %v958_v30 = vrot.slane %v954_v29, %v2169_v5  ;;  %v963_v47 = vrot.slane %v954_v29, %v2399_v13 }
 0x200   :  { %692 = vperm.xlu1 %2018, %v2184_v8  }
 0x201   :  { %v985_v0 = vmul.f32 %v958_v30, %v2386_v56 }
 0x204   :  { %2019 = vset.pattern.permute.xlu1 %v2105_v25 }
 0x205   :  { %1043 = vperm.xlu1 %2019, %v2210_v16  }
 0x207   :  { %v2051_v48 = vpop.eup %2050 }
 0x208   :  { %v635_v46 = vadd.f32 1.0, %v2051_v48  ;;  %v2053_v35 = vpop.eup %2052 }
 0x209   :  { %284 = vperm.xlu1 %2019, %v2491_v34   ;;  %v621_v50 = vadd.f32 1.0, %v2053_v35 }
 0x20a   :  { %2054 = vrcp.f32 %v635_v46 }
 0x20b   :  { %2056 = vrcp.f32 %v621_v50 }
 0x20d   :  { %2020 = vset.pattern.permute.xlu1 %v2106_v27 }
 0x20e   :  { %1053 = vperm.xlu1 %2020, %v2205_v15  }
 0x212   :  { %330 = vperm.xlu0 %2011, %v2179_v7  }
 0x214   :  { %v2055_v33 = vpop.eup %2054 }
 0x215   :  { %v641_v8 = vmul.f32 %v2055_v33, %v2491_v34  ;;  %v2057_v4 = vpop.eup %2056 }
 0x216   :  { %696 = vperm.xlu0 %2011, %v2189_v9   ;;  %v656_v42 = vsub.f32 1.0, %v2057_v4 }
 0x217   :  { %v645_v41 = vrot.slane %v641_v8, %v2169_v5  ;;  %v650_v53 = vrot.slane %v641_v8, %v2399_v13 }
 0x218   :  { %v657_v6 = vmul.f32 %v656_v42, %v2491_v34 }
 0x219   :  { %v646_v60 = vmul.f32 %v645_v41, %v2448_v28  ;;  %v651_v61 = vmul.f32 %v650_v53, %v2455_v39  ;;  %v959_v41 = vmul.f32 %v958_v30, %v2430_v43  ;;  %v964_v53 = vmul.f32 %v963_v47, %v2425_v38 }
 0x21a   :  { %293 = vperm.xlu0 %2011, %v2491_v34   ;;  %v986_v34 = vmul.f32 %v963_v47, %v2408_v18 }
 0x21b   :  { %v652_v55 = vadd.f32 %v651_v61, %v646_v60 }
 0x21c   :  { %v987_v33 = vadd.f32 %v986_v34, %v985_v0 }
 0x21d   :  { %v653_v7 = vadd.f32 %v652_v55, %v640_v10  ;;  %v965_v10 = vadd.f32 %v964_v53, %v959_v41 }
 0x21e   :  { %2021 = vset.pattern.permute.xlu0 %v2105_v25 }
 0x21f   :  { %v654_v52 = vadd.f32 %v2470_v19, %v653_v7 }
 0x221   :  { %2058 = vtanh.f32 %v654_v52 }
 0x22b   :  { %v2059_v45 = vpop.eup %2058 }
 0x22c   :  { %v658_v14 = vmul.f32 %v2059_v45, %v2057_v4  ;;  %v1000_v4 = vmul.f32 %v963_v47, %v2451_v31 }
 0x22e   :  { %v659_v49 = vadd.f32 %v658_v14, %v657_v6 }
 0x230   :  { %v969_v40 = vrot.slane %v659_v49, %v2169_v5  ;;  %v974_v48 = vrot.slane %v659_v49, %v2399_v13  ;;  %667 = vperm.xlu1 %2020, %v659_v49   ;;  %662 = vperm.xlu0 %2021, %v659_v49  }
 0x232   :  { %v988_v46 = vmul.f32 %v969_v40, %v2396_v58  ;;  %v989_v35 = vmul.f32 %v974_v48, %v2412_v20  ;;  %v970_v24 = vmul.f32 %v969_v40, %v2432_v44  ;;  %v975_v50 = vmul.f32 %v974_v48, %v2428_v26 }
 0x234   :  { %v990_v8 = vadd.f32 %v989_v35, %v988_v46  ;;  %2022 = vset.pattern.permute.xlu0 %v2106_v27  ;;  %2024 = vset.pattern.permute.xlu1 %v2105_v25  ;;  %v976_v60 = vadd.f32 %v975_v50, %v970_v24 }
 0x235   :  { %1057 = vperm.xlu0 %2022, %v2210_v16  }
 0x236   :  { %v991_v51 = vadd.f32 %v990_v8, %v987_v33  ;;  %v977_v55 = vadd.f32 %v976_v60, %v965_v10 }
 0x238   :  { %v992_v54 = vadd.f32 %v2423_v36, %v991_v51  ;;  %v978_v16 = vadd.f32 %v977_v55, %v2443_v21 }
 0x239   :  { %2023 = vset.pattern.permute.xlu0 %v2105_v25 }
 0x23a   :  { %v1775_v61 = vmul.f32 -1.442695, %v992_v54  ;;  %682 = vperm.xlu0 %2023, %v2189_v9   ;;  %v1774_v7 = vmul.f32 -1.442695, %v978_v16 }
 0x23c   :  { %2060 = vpow2.f32 %v1775_v61 }
 0x23d   :  { %2062 = vpow2.f32 %v1774_v7 }
 0x23e   :  { %1038 = vperm.xlu0 %2023, %v2205_v15   ;;  %v999_v15 = vmul.f32 %v958_v30, %v2445_v2 }
 0x240   :  { %v1001_v45 = vadd.f32 %v1000_v4, %v999_v15  ;;  %v309_v15 = vsub.s32 3, %v2166_v3 }
 0x242   :  { %1399 = vperm.xlu0 %2023, %v2319_v37  }
 0x246   :  { %2030 = vset.pattern.permute.xlu0 %v2106_v27  ;;  %v2061_v59 = vpop.eup %2060 }
 0x247   :  { %1418 = vperm.xlu0 %2030, %v2341_v63   ;;  %v996_v52 = vadd.f32 1.0, %v2061_v59  ;;  %v2063_v9 = vpop.eup %2062 }
 0x248   :  { %v982_v22 = vadd.f32 1.0, %v2063_v9 }
 0x249   :  { %2064 = vrcp.f32 %v996_v52 }
 0x24a   :  { %2066 = vrcp.f32 %v982_v22  ;;  %v50_v22 = vld [vmem:[%s2812_s3] sm:$0xf] }
 0x24b   :  { %2033 = vset.pattern.permute.xlu0 %v2105_v25 }
 0x253   :  { %v2065_v62 = vpop.eup %2064 }
 0x254   :  { %v1002_v11 = vmul.f32 %v2065_v62, %v659_v49  ;;  %v2067_v40 = vpop.eup %2066 }
 0x255   :  { %v1017_v30 = vsub.f32 1.0, %v2067_v40 }
 0x256   :  { %v1006_v37 = vrot.slane %v1002_v11, %v2169_v5  ;;  %v1011_v23 = vrot.slane %v1002_v11, %v2399_v13  ;;  %v304_v11 = vsub.s32 2, %v2166_v3  ;;  %v2637_v3 = vrot.slane %v50_v22, %v2169_v5 }
 0x257   :  { %v1018_v34 = vmul.f32 %v1017_v30, %v659_v49 }
 0x258   :  { %v1007_v29 = vmul.f32 %v1006_v37, %v2448_v28  ;;  %v1012_v42 = vmul.f32 %v1011_v23, %v2455_v39 }
 0x25a   :  { %v1013_v6 = vadd.f32 %v1012_v42, %v1007_v29  ;;  %v2639_v42 = vrot.slane %v50_v22, %v304_v11 }
 0x25c   :  { %v1014_v14 = vadd.f32 %v1013_v6, %v1001_v45  ;;  %v2642_v45 = vrot.slane %v50_v22, %v2399_v13 }
 0x25e   :  { %v1015_v0 = vadd.f32 %v2470_v19, %v1014_v14 }
 0x260   :  { %2068 = vtanh.f32 %v1015_v0 }
 0x269   :  { %v1280_v35 = vpop.xlane.xlu1 %1279 }
 0x26a   :  { %v2069_v48 = vpop.eup %2068  ;;  %v1281_v51 = vmul.f32 %v1280_v35, %v2453_v32 }
 0x26b   :  { %v1019_v47 = vmul.f32 %v2069_v48, %v2067_v40 }
 0x26c   :  { %v1282_v61 = vsel %vm126_vm15, %v1281_v51, 0.0 }
 0x26d   :  { %v2589_v46 = vadd.f32 %v1019_v47, %v1018_v34  ;;  %v316_v33 = vpop.permute.xlu1 %315 }
 0x26f   :  { %1023 = vperm.xlu1 %2024, %v2589_v46   ;;  %v1330_v54 = vrot.slane %v2589_v46, %v2169_v5  ;;  %v1335_v60 = vrot.slane %v2589_v46, %v2399_v13 }
 0x271   :  { %v321_v8 = vpop.permute.xlu1 %320  ;;  %v1349_v16 = vmul.f32 %v1330_v54, %v2396_v58  ;;  %v1350_v7 = vmul.f32 %v1335_v60, %v2412_v20  ;;  %v1331_v37 = vmul.f32 %v1330_v54, %v2432_v44 }
 0x273   :  { %2025 = vset.pattern.permute.xlu1 %v2106_v27 }
 0x274   :  { %1028 = vperm.xlu1 %2025, %v2589_v46  }
 0x275   :  { %v335_v24 = vpop.permute.xlu1 %334 }
 0x278   :  { %2026 = vset.pattern.permute.xlu1 %v2105_v25 }
 0x27a   :  { %v2595_v50 = vpop.permute.xlu1 %677 }
 0x27f   :  { %v2599_v53 = vpop.permute.xlu1 %692 }
 0x284   :  { %v2617_v59 = vpop.permute.xlu1 %1043 }
 0x289   :  { %v1312_v49 = vpop.xlane.xlu0 %1311 }
 0x28a   :  { %v1313_v41 = vmul.f32 %v1312_v49, %v2484_v12 }
 0x28c   :  { %v1314_v10 = vsel %vm159_vm14, %v1313_v41, 0.0 }
 0x28d   :  { %v1315_v55 = vadd.f32 %v1314_v10, %v1282_v61 }
 0x28f   :  { %v2610_v32 = vrot.slane %v1315_v55, %v2169_v5  ;;  %v2613_v12 = vrot.slane %v1315_v55, %v2399_v13 }
 0x291   :  { %v1346_v52 = vmul.f32 %v2610_v32, %v2386_v56  ;;  %v1347_v9 = vmul.f32 %v2613_v12, %v2408_v18  ;;  %v331_v62 = vpop.permute.xlu0 %330  ;;  %v1320_v58 = vmul.f32 %v2610_v32, %v2430_v43  ;;  %v1325_v20 = vmul.f32 %v2613_v12, %v2425_v38  ;;  %v285_v38 = vpop.permute.xlu1 %284 }
 0x292   :  { %v1351_v56 = vadd.f32 %v1350_v7, %v1349_v16  ;;  %v1336_v18 = vmul.f32 %v1335_v60, %v2428_v26  ;;  %v2644_v43 = vrot.slane %v50_v22, %v309_v15  ;;  %v291_v40 = vmul.f32 %v2637_v3, %v285_v38 }
 0x293   :  { %v1348_v4 = vadd.f32 %v1347_v9, %v1346_v52  ;;  %v1326_v6 = vadd.f32 %v1325_v20, %v1320_v58  ;;  %v306_v30 = vmul.f32 %v2639_v42, %v285_v38 }
 0x294   :  { %v1337_v44 = vadd.f32 %v1336_v18, %v1331_v37 }
 0x295   :  { %v1352_v23 = vadd.f32 %v1351_v56, %v1348_v4  ;;  %v2634_v29 = vpop.permute.xlu0 %696  ;;  %v2656_v18 = vpop.permute.xlu1 %1053 }
 0x296   :  { %v1338_v47 = vadd.f32 %v1337_v44, %v1326_v6  ;;  %v1757_v44 = vld [vmem:[%s2809_s0 + $0x10] sm:$0xff] }
 0x297   :  { %v1353_v14 = vadd.f32 %v2423_v36, %v1352_v23 }
 0x298   :  { %v1339_v60 = vadd.f32 %v1338_v47, %v2443_v21 }
 0x299   :  { %v1788_v0 = vmul.f32 -1.442695, %v1353_v14  ;;  %v294_v26 = vpop.permute.xlu0 %293 }
 0x29a   :  { %v300_v48 = vmul.f32 %v2642_v45, %v294_v26  ;;  %v311_v34 = vmul.f32 %v2644_v43, %v294_v26  ;;  %v1787_v4 = vmul.f32 -1.442695, %v1339_v60 }
 0x29b   :  { %2070 = vpow2.f32 %v1788_v0 }
 0x29c   :  { %v301_v35 = vadd.f32 %v300_v48, %v291_v40  ;;  %v312_v51 = vadd.f32 %v311_v34, %v306_v30  ;;  %2072 = vpow2.f32 %v1787_v4 }
 0x29e   :  { %v326_v49 = vrot.slane %v301_v35, %v2169_v5  ;;  %v340_v41 = vrot.slane %v301_v35, %v2399_v13  ;;  %v430_v36 = vrot.slane %v312_v51, %v2169_v5  ;;  %v436_v54 = vrot.slane %v312_v51, %v2399_v13 }
 0x29f   :  { %v1360_v51 = vmul.f32 %v2610_v32, %v2445_v2 }
 0x2a0   :  { %v431_v61 = vmul.f32 %v430_v36, %v316_v33  ;;  %v432_v10 = vmul.f32 %v430_v36, %v321_v8  ;;  %v437_v55 = vmul.f32 %v436_v54, %v331_v62  ;;  %v438_v16 = vmul.f32 %v436_v54, %v335_v24 }
 0x2a1   :  { %v327_v7 = vmul.f32 %v326_v49, %v316_v33  ;;  %v328_v52 = vmul.f32 %v326_v49, %v321_v8  ;;  %v341_v9 = vmul.f32 %v340_v41, %v331_v62  ;;  %v342_v11 = vmul.f32 %v340_v41, %v335_v24  ;;  %v76_v33 = vld [vmem:[%s2809_s0 + $0x8] sm:$0xff] }
 0x2a2   :  { %v439_v58 = vadd.f32 %v437_v55, %v431_v61  ;;  %v440_v20 = vadd.f32 %v438_v16, %v432_v10  ;;  %v1361_v41 = vmul.f32 %v2613_v12, %v2451_v31 }
 0x2a3   :  { %v343_v15 = vadd.f32 %v341_v9, %v327_v7  ;;  %v344_v22 = vadd.f32 %v342_v11, %v328_v52 }
 0x2a4   :  { %v1951_v21 = vpack.c.bf16 %v440_v20, %v439_v58  ;;  %v1362_v58 = vadd.f32 %v1361_v41, %v1360_v51 }
 0x2a5   :  { %v1947_v56 = vpack.c.bf16 %v344_v22, %v343_v15  ;;  %v2071_v37 = vpop.eup %2070 }
 0x2a6   :  { %v1357_v23 = vadd.f32 1.0, %v2071_v37  ;;  %v2073_v48 = vpop.eup %2072 }
 0x2a7   :  { %1948 = vmatprep.subr.bf16.mxu1 %v1947_v56  ;;  %v1343_v60 = vadd.f32 1.0, %v2073_v48 }
 0x2a8   :  { %1950 = vmatpush3.bf16.msra.mxu1 %v1947_v56  ;;  %2074 = vrcp.f32 %v1357_v23 }
 0x2a9   :  { %1952 = vmatprep.subr.bf16.mxu1 %v1951_v21  ;;  %2076 = vrcp.f32 %v1343_v60 }
 0x2ab   :  { %1855 = vmatmul.mubr.msk.f32.vlgmr.msra.gmra.mrb[0].mxu1 %vm345_vm9, %v76_v33 }
 0x2ac   :  { %1954 = vmatpush3.bf16.msra.mxu1 %v1951_v21  ;;  %1861 = vmatprep.mubr.msk.f32.mxu1 %vm345_vm9, %v2556_v1 }
 0x2af   :  { %v663_v8 = vpop.permute.xlu0 %662  ;;  %v668_v24 = vpop.permute.xlu1 %667  ;;  %1862 = vmatmul.mubr.msk.f32.vlgmr.msra.gmra.mrb[2].mxu1 %vm345_vm9, %v76_v33 }
 0x2b0   :  { %v665_v62 = vmul.f32 %v663_v8, %v2637_v3  ;;  %v672_v38 = vmul.f32 %v663_v8, %v2639_v42  ;;  %v670_v6 = vmul.f32 %v668_v24, %v2642_v45  ;;  %v673_v14 = vmul.f32 %v668_v24, %v2644_v43  ;;  %1868 = vmatprep.mubr.msk.f32.mxu1 %vm345_vm9, %v1757_v44  ;;  %v2080_v24 = vld [vmem:[%s2810_s1 + $0x30] sm:$0xff] }
 0x2b2   :  { %v671_v0 = vadd.f32 %v670_v6, %v665_v62  ;;  %v674_v26 = vadd.f32 %v673_v14, %v672_v38  ;;  %v2075_v47 = vpop.eup %2074  ;;  %v1599_v62 = vld [vmem:[%s2813_s4] sm:$0xff]  ;;  %v1600_v38 = vld [vmem:[%s2813_s4 + $0x8] sm:$0xff] }
 0x2b3   :  { %v1363_v49 = vmul.f32 %v2075_v47, %v2589_v46  ;;  %1606 = vperm.xlu0 %2033, %v1600_v38  }
 0x2b4   :  { %v702_v1 = vrot.slane %v671_v0, %v2399_v13  ;;  %v2674_v40 = vpop.permute.xlu0 %1057  ;;  %v688_v30 = vrot.slane %v671_v0, %v2169_v5  ;;  %v797_v34 = vrot.slane %v674_v26, %v2399_v13  ;;  %v791_v35 = vrot.slane %v674_v26, %v2169_v5 }
 0x2b5   :  { %v1367_v61 = vrot.slane %v1363_v49, %v2169_v5  ;;  %v1372_v10 = vrot.slane %v1363_v49, %v2399_v13 }
 0x2b6   :  { %v703_v36 = vmul.f32 %v702_v1, %v2599_v53  ;;  %v689_v54 = vmul.f32 %v688_v30, %v2595_v50  ;;  %v798_v55 = vmul.f32 %v797_v34, %v2599_v53  ;;  %v704_v7 = vmul.f32 %v702_v1, %v2634_v29 }
 0x2b7   :  { %v792_v32 = vmul.f32 %v791_v35, %v2595_v50  ;;  %v799_v31 = vmul.f32 %v797_v34, %v2634_v29  ;;  %v1368_v12 = vmul.f32 %v1367_v61, %v2448_v28  ;;  %v1373_v9 = vmul.f32 %v1372_v10, %v2455_v39  ;;  %v1758_v28 = vld [vmem:[%s2809_s0 + $0x18] sm:$0xff]  ;;  %v2703_v39 = vld [vmem:[%s2809_s0 + $0x20] sm:$0xff]  ;;  %v2077_v29 = vpop.eup %2076  ;;  %2035 = vset.pattern.permute.xlu0 %v2106_v27 }
 0x2b8   :  { %v705_v22 = vadd.f32 %v703_v36, %v689_v54 }
 0x2b9   :  { %v683_v16 = vpop.permute.xlu0 %682  ;;  %v1374_v20 = vadd.f32 %v1373_v9, %v1368_v12  ;;  %v800_v4 = vadd.f32 %v798_v55, %v792_v32 }
 0x2ba   :  { %v690_v2 = vmul.f32 %v688_v30, %v683_v16  ;;  %v793_v52 = vmul.f32 %v791_v35, %v683_v16 }
 0x2bb   :  { %v1375_v56 = vadd.f32 %v1374_v20, %v1362_v58 }
 0x2bc   :  { %v706_v11 = vadd.f32 %v704_v7, %v690_v2  ;;  %v801_v15 = vadd.f32 %v799_v31, %v793_v52  ;;  %v1771_v52 = vld [vmem:[%s2809_s0 + $0x28] sm:$0xff]  ;;  %v2108_v31 = vmov 0.0|0.0  }
 0x2bd   :  { %v1376_v50 = vadd.f32 %v2470_v19, %v1375_v56  ;;  %v1378_v19 = vsub.f32 1.0, %v2077_v29  ;;  %v1039_v48 = vpop.permute.xlu0 %1038  ;;  %1979 = vmatprep.subr.bf16.mxu0 %v2108_v31 }
 0x2be   :  { %v1955_v53 = vpack.c.bf16 %v706_v11, %v705_v22  ;;  %v1959_v37 = vpack.c.bf16 %v801_v15, %v800_v4 }
 0x2bf   :  { %2078 = vtanh.f32 %v1376_v50  ;;  %v1379_v21 = vmul.f32 %v1378_v19, %v2589_v46 }
 0x2c0   :  { %1956 = vmatprep.subr.bf16.mxu1 %v1955_v53 }
 0x2c1   :  { %1958 = vmatpush3.bf16.msra.mxu1 %v1955_v53  ;;  %v1400_v22 = vpop.permute.xlu0 %1399 }
 0x2c2   :  { %1960 = vmatprep.subr.bf16.mxu1 %v1959_v37 }
 0x2c4   :  { %1869 = vmatmul.mubr.msk.f32.vlgmr.msra.gmra.mrb[4].mxu1 %vm345_vm9, %v1758_v28 }
 0x2c5   :  { %1962 = vmatpush3.bf16.msra.mxu1 %v1959_v37  ;;  %1875 = vmatprep.mubr.msk.f32.mxu1 %vm345_vm9, %v1757_v44 }
 0x2c6   :  { %v1419_v50 = vpop.permute.xlu0 %1418 }
 0x2c8   :  { %1876 = vmatmul.mubr.msk.f32.vlgmr.msra.gmra.mrb[6].mxu1 %vm345_vm9, %v1758_v28 }
 0x2c9   :  { %1882 = vmatprep.mubr.msk.f32.mxu1 %vm345_vm9, %v2703_v39  ;;  %v2079_v23 = vpop.eup %2078 }
 0x2ca   :  { %v1380_v33 = vmul.f32 %v2079_v23, %v2077_v29 }
 0x2cc   :  { %v1381_v8 = vadd.f32 %v1380_v33, %v1379_v21 }
 0x2ce   :  { %1384 = vperm.xlu1 %2026, %v1381_v8   ;;  %1719 = vst.msk [vmem:[#allocation2] sm:$0x3] %vm1718_vm8, %v1381_v8 }
 0x2d2   :  { %2027 = vset.pattern.permute.xlu1 %v2106_v27 }
 0x2d3   :  { %1389 = vperm.xlu1 %2027, %v1381_v8  }
 0x2d7   :  { %2028 = vset.pattern.permute.xlu1 %v2105_v25 }
 0x2d8   :  { %1404 = vperm.xlu1 %2028, %v2341_v63   ;;  %v1601_v63 = vld [vmem:[%s2813_s4 + $0x10] sm:$0xff] }
 0x2d9   :  { %1621 = vperm.xlu0 %2035, %v1601_v63  }
 0x2dc   :  { %2029 = vset.pattern.permute.xlu1 %v2106_v27 }
 0x2dd   :  { %1414 = vperm.xlu1 %2029, %v2080_v24  }
 0x2e1   :  { %2031 = vset.pattern.permute.xlu1 %v2105_v25 }
 0x2e2   :  { %1603 = vperm.xlu1 %2031, %v1599_v62  }
 0x2e6   :  { %2032 = vset.pattern.permute.xlu1 %v2106_v27 }
 0x2e7   :  { %1615 = vperm.xlu1 %2032, %v1599_v62  }
 0x2eb   :  { %1618 = vperm.xlu1 %2032, %v1600_v38  }
 0x2ee   :  { %v1024_v46 = vpop.permute.xlu1 %1023 }
 0x2ef   :  { %v1026_v6 = vmul.f32 %v1024_v46, %v2637_v3  ;;  %v1033_v44 = vmul.f32 %v1024_v46, %v2639_v42  ;;  %2034 = vset.pattern.permute.xlu1 %v2105_v25  ;;  %v1783_v25 = vld [vmem:[%s2809_s0 + $0x30] sm:$0xff] }
 0x2f0   :  { %1609 = vperm.xlu1 %2034, %v1601_v63  }
 0x2f3   :  { %v1029_v14 = vpop.permute.xlu1 %1028 }
 0x2f4   :  { %v1031_v0 = vmul.f32 %v1029_v14, %v2642_v45  ;;  %v1034_v26 = vmul.f32 %v1029_v14, %v2644_v43 }
 0x2f6   :  { %v1032_v1 = vadd.f32 %v1031_v0, %v1026_v6  ;;  %v1035_v30 = vadd.f32 %v1034_v26, %v1033_v44 }
 0x2f8   :  { %v1063_v34 = vrot.slane %v1032_v1, %v2399_v13  ;;  %v1158_v47 = vrot.slane %v1035_v30, %v2399_v13  ;;  %v1049_v35 = vrot.slane %v1032_v1, %v2169_v5  ;;  %v1152_v51 = vrot.slane %v1035_v30, %v2169_v5 }
 0x2fa   :  { %v1065_v27 = vmul.f32 %v1063_v34, %v2674_v40  ;;  %v1160_v49 = vmul.f32 %v1158_v47, %v2674_v40  ;;  %v1050_v41 = vmul.f32 %v1049_v35, %v1039_v48  ;;  %v1051_v36 = vmul.f32 %v1049_v35, %v2617_v59 }
 0x2fb   :  { %v1064_v54 = vmul.f32 %v1063_v34, %v2656_v18  ;;  %v1153_v60 = vmul.f32 %v1152_v51, %v1039_v48  ;;  %v1154_v61 = vmul.f32 %v1152_v51, %v2617_v59  ;;  %v1159_v10 = vmul.f32 %v1158_v47, %v2656_v18 }
 0x2fc   :  { %v1067_v55 = vadd.f32 %v1065_v27, %v1051_v36 }
 0x2fd   :  { %v1066_v16 = vadd.f32 %v1064_v54, %v1050_v41  ;;  %v1161_v7 = vadd.f32 %v1159_v10, %v1153_v60  ;;  %v1162_v2 = vadd.f32 %v1160_v49, %v1154_v61 }
 0x2ff   :  { %v1963_v32 = vpack.c.bf16 %v1067_v55, %v1066_v16  ;;  %v1967_v40 = vpack.c.bf16 %v1162_v2, %v1161_v7 }
 0x301   :  { %1964 = vmatprep.subr.bf16.mxu1 %v1963_v32 }
 0x302   :  { %1966 = vmatpush3.bf16.msra.mxu1 %v1963_v32 }
 0x303   :  { %1968 = vmatprep.subr.bf16.mxu1 %v1967_v40 }
 0x305   :  { %1883 = vmatmul.mubr.msk.f32.vlgmr.msra.gmra.mrb[8].mxu1 %vm345_vm9, %v1771_v52 }
 0x306   :  { %1970 = vmatpush3.bf16.msra.mxu1 %v1967_v40  ;;  %1889 = vmatprep.mubr.msk.f32.mxu1 %vm345_vm9, %v2703_v39 }
 0x309   :  { %1890 = vmatmul.mubr.msk.f32.vlgmr.msra.gmra.mrb[10].mxu1 %vm345_vm9, %v1771_v52 }
 0x30a   :  { %1896 = vmatprep.mubr.msk.f32.mxu1 %vm345_vm9, %v1783_v25 }
 0x332   :  { %v1607_v32 = vpop.permute.xlu0 %1606 }
 0x333   :  { %vm1612_vm14 = vcmp.eq.s32.totalorder %v2248_v57, %v1607_v32 }
 0x34d   :  { %v1385_v59 = vpop.permute.xlu1 %1384 }
 0x34e   :  { %v1387_v12 = vmul.f32 %v1385_v59, %v2637_v3  ;;  %v1394_v9 = vmul.f32 %v1385_v59, %v2639_v42  ;;  %v2110_v59 = vmov 1.0  }
 0x352   :  { %v1390_v18 = vpop.permute.xlu1 %1389 }
 0x353   :  { %v1392_v11 = vmul.f32 %v1390_v18, %v2642_v45  ;;  %v1395_v15 = vmul.f32 %v1390_v18, %v2644_v43 }
 0x355   :  { %v1393_v58 = vadd.f32 %v1392_v11, %v1387_v12  ;;  %v1396_v20 = vadd.f32 %v1395_v15, %v1394_v9 }
 0x357   :  { %v1410_v53 = vrot.slane %v1393_v58, %v2169_v5  ;;  %v1405_v4 = vpop.permute.xlu1 %1404  ;;  %v1424_v56 = vrot.slane %v1393_v58, %v2399_v13  ;;  %v1513_v37 = vrot.slane %v1396_v20, %v2169_v5  ;;  %v1519_v28 = vrot.slane %v1396_v20, %v2399_v13  ;;  %v1784_v5 = vld [vmem:[%s2809_s0 + $0x38] sm:$0xff]  ;;  %s2111_s0 = smov [#allocation2]  }
 0x358   :  { %v1622_v52 = vpop.permute.xlu0 %1621  ;;  %s1728_s29 = sshll.u32 %s2111_s0, 4  ;;  %s1729_s29 = int_to_ptr.vmem [resolvable:$true] %s1728_s29 }
 0x359   :  { %v1412_v3 = vmul.f32 %v1410_v53, %v1405_v4  ;;  %v1426_v39 = vmul.f32 %v1424_v56, %v1419_v50  ;;  %v1515_v42 = vmul.f32 %v1513_v37, %v1405_v4  ;;  %v1521_v29 = vmul.f32 %v1519_v28, %v1419_v50  ;;  %s2081_s30 = scalar_lea.vmem %s1729_s29, 32  ;;  %p2086_p1 = scmp.lt.s32.totalorder %s1729_s29, %s1729_s29 }
 0x35a   :  { %v1411_v19 = vmul.f32 %v1410_v53, %v1400_v22  ;;  %v1514_v43 = vmul.f32 %v1513_v37, %v1400_v22  ;;  %vm1625_vm0 = vcmp.eq.s32.totalorder %v2248_v57, %v1622_v52  ;;  %p2082_p0 = scmp.ne.s32.totalorder %s1729_s29, %s2081_s30  ;;  %p2087_p2 = scmp.lt.s32.totalorder %s2081_s30, %s2081_s30 }
 0x35b   :  { %v1428_v33 = vadd.f32 %v1426_v39, %v1412_v3  ;;  %v1523_v46 = vadd.f32 %v1521_v29, %v1515_v42 }
 0x35c   :  { %v1415_v45 = vpop.permute.xlu1 %1414  ;;  %p2088_p3 = por %p2087_p2, %p2086_p1 }
 0x35d   :  { %v1425_v23 = vmul.f32 %v1424_v56, %v1415_v45  ;;  %v1520_v21 = vmul.f32 %v1519_v28, %v1415_v45 }
 0x35e   :  { %p2089_p4 = pnand %p2088_p3, %p2082_p0 }
 0x35f   :  { %v1427_v8 = vadd.f32 %v1425_v23, %v1411_v19  ;;  %v1522_v24 = vadd.f32 %v1520_v21, %v1514_v43 }
 0x361   :  { %v1971_v62 = vpack.c.bf16 %v1428_v33, %v1427_v8  ;;  %v1975_v38 = vpack.c.bf16 %v1523_v46, %v1522_v24  ;;  %v1604_v16 = vpop.permute.xlu1 %1603 }
 0x362   :  { %vm1611_vm11 = vcmp.eq.s32.totalorder %v2248_v57, %v1604_v16 }
 0x363   :  { %1972 = vmatprep.subr.bf16.mxu1 %v1971_v62 }
 0x364   :  { %1974 = vmatpush3.bf16.msra.mxu1 %v1971_v62 }
 0x365   :  { %1976 = vmatprep.subr.bf16.mxu1 %v1975_v38 }
 0x366   :  { %v1616_v2 = vpop.permute.xlu1 %1615 }
 0x367   :  { %1897 = vmatmul.mubr.msk.f32.vlgmr.msra.gmra.mrb[12].mxu1 %vm345_vm9, %v1784_v5  ;;  %vm1623_vm12 = vcmp.eq.s32.totalorder %v2248_v57, %v1616_v2 }
 0x368   :  { %1978 = vmatpush3.bf16.msra.mxu1 %v1975_v38  ;;  %1903 = vmatprep.mubr.msk.f32.mxu1 %vm345_vm9, %v1783_v25  ;;  %vm1626_vm13 = vmor %vm1611_vm11, %vm1623_vm12 }
 0x36a   :  { %v1619_v40 = vpop.permute.xlu1 %1618 }
 0x36b   :  { %1904 = vmatmul.mubr.msk.f32.vlgmr.msra.gmra.mrb[14].mxu1 %vm345_vm9, %v1784_v5  ;;  %vm1624_vm15 = vcmp.eq.s32.totalorder %v2248_v57, %v1619_v40 }
 0x36c   :  { %vm1627_vm3 = vmor %vm1612_vm14, %vm1624_vm15 }
 0x36f   :  { %v1610_v25 = vpop.permute.xlu1 %1609 }
 0x370   :  { %vm1613_vm2 = vcmp.eq.s32.totalorder %v2248_v57, %v1610_v25 }
 0x371   :  { %vm1628_vm4 = vmor %vm1613_vm2, %vm1625_vm0 }
 0x37e   :  { %v1856_v13 = vpop.f32.mrb[0].mxu1 }
 0x37f   :  { %v418_v63 = vpop.f32.mrb[1].mxu1 }
 0x380   :  { %v1980_v6 = vpack.c.bf16 %v1856_v13, %v418_v63 }
 0x382   :  { %v1863_v14 = vpop.f32.mrb[2].mxu1  ;;  %1981 = vmatpush3.bf16.msra.mxu0 %v1980_v6 }
 0x383   :  { %v507_v44 = vpop.f32.mrb[3].mxu1  ;;  %1982 = vmatprep.subr.bf16.mxu0 %v2108_v31 }
 0x384   :  { %v1992_v0 = vpack.c.bf16 %v1863_v14, %v507_v44 }
 0x397   :  { %v1870_v26 = vpop.f32.mrb[4].mxu1 }
 0x398   :  { %v779_v1 = vpop.f32.mrb[5].mxu1 }
 0x399   :  { %v1983_v30 = vpack.c.bf16 %v1870_v26, %v779_v1 }
 0x39b   :  { %v1877_v48 = vpop.f32.mrb[6].mxu1  ;;  %1984 = vmatpush3.bf16.msra.mxu0 %v1983_v30 }
 0x39c   :  { %v868_v34 = vpop.f32.mrb[7].mxu1  ;;  %1985 = vmatprep.subr.bf16.mxu0 %v2108_v31 }
 0x39d   :  { %v1995_v47 = vpack.c.bf16 %v1877_v48, %v868_v34 }
 0x3d8   :  { %v1884_v35 = vpop.f32.mrb[8].mxu1 }
 0x3d9   :  { %v1140_v51 = vpop.f32.mrb[9].mxu1 }
 0x3da   :  { %v1986_v27 = vpack.c.bf16 %v1884_v35, %v1140_v51 }
 0x3dc   :  { %v1891_v49 = vpop.f32.mrb[10].mxu1  ;;  %1987 = vmatpush3.bf16.msra.mxu0 %v1986_v27 }
 0x3dd   :  { %v1229_v41 = vpop.f32.mrb[11].mxu1  ;;  %1988 = vmatprep.subr.bf16.mxu0 %v2108_v31 }
 0x3de   :  { %v1998_v36 = vpack.c.bf16 %v1891_v49, %v1229_v41 }
 0x43a   :  { %v1898_v54 = vpop.f32.mrb[12].mxu1 }
 0x43b   :  { %v1501_v60 = vpop.f32.mrb[13].mxu1 }
 0x43c   :  { %v1989_v61 = vpack.c.bf16 %v1898_v54, %v1501_v60 }
 0x43e   :  { %1990 = vmatpush3.bf16.msra.mxu0 %v1989_v61  ;;  %v1905_v10 = vpop.f32.mrb[14].mxu1 }
 0x43f   :  { %1991 = vmatprep.subr.bf16.mxu0 %v2108_v31  ;;  %v1590_v55 = vpop.f32.mrb[15].mxu1 }
 0x440   :  { %v2001_v7 = vpack.c.bf16 %v1905_v10, %v1590_v55 }
 0x442   :  { %1993 = vmatpush3.bf16.msra.mxu0 %v1992_v0 }
 0x443   :  { %1994 = vmatprep.subr.bf16.mxu0 %v2108_v31 }
 0x446   :  { %1996 = vmatpush3.bf16.msra.mxu0 %v1995_v47 }
 0x447   :  { %1997 = vmatprep.subr.bf16.mxu0 %v2108_v31 }
 0x44a   :  { %1999 = vmatpush3.bf16.msra.mxu0 %v1998_v36 }
 0x44b   :  { %2000 = vmatprep.subr.bf16.mxu0 %v2108_v31 }
 0x44e   :  { %2002 = vmatpush3.bf16.msra.mxu0 %v2001_v7 }
 0x451   :  { %1939 = vmatmul.mubr.msk.f32.vlgmr.msra.gmra.mrb[0].mxu0 %vm1626_vm13, %v2110_v59 }
 0x452   :  { %1941 = vmatprep.mubr.msk.f32.mxu0 %vm2109_vm10, %v2107_v17 }
 0x455   :  { %1942 = vmatmul.mubr.msk.f32.gmra.mrb[2].mxu0 %vm1627_vm3, %v2110_v59 }
 0x456   :  { %1944 = vmatprep.mubr.msk.f32.mxu0 %vm2109_vm10, %v2107_v17 }
 0x459   :  { %1945 = vmatmul.mubr.msk.f32.gmra.mrb[4].mxu0 %vm1628_vm4, %v2110_v59 }
 0x45a   :  { %2092 = shalt.err (!%p2089_p4)
}
 0x45b   :  { %s2093_s10 = scalar_lea.hbm %s2818_s9, 32 }
 0x45c   :  { %p2094_p5 = scmp.ne.s32.totalorder %s2818_s9, %s2093_s10  ;;  %p2097_p6 = scmp.lt.u32.totalorder %s2093_s10, %s2818_s9 }
 0x45e   :  { %p2099_p7 = pnand %p2097_p6, %p2094_p5 }
 0x460   :  { %2102 = shalt.err (!%p2099_p7)
}
 0x461   :  { %1731 = dma.vmem_to_hbm [thread:$0]  %s1729_s29, 32, %s2818_s9, [#allocation3]  }
 0x524   :  { %v1701_v57 = vpop.f32.mrb[0].mxu0 }
 0x525   :  { %1715 = vst [vmem:[%s2817_s8] sm:$0xff] %v1701_v57  ;;  %v1940_v17 = vpop.f32.mrb[1].mxu0 }
 0x528   :  { %v1706_v31 = vpop.f32.mrb[2].mxu0 }
 0x529   :  { %1716 = vst [vmem:[%s2817_s8 + $0x8] sm:$0xff] %v1706_v31  ;;  %v1943_v18 = vpop.f32.mrb[3].mxu0 }
 0x52c   :  { %v1711_v12 = vpop.f32.mrb[4].mxu0 }
 0x52d   :  { %1717 = vst [vmem:[%s2817_s8 + $0x10] sm:$0xff] %v1711_v12  ;;  %v1946_v9 = vpop.f32.mrb[5].mxu0 }
 0x52e   :  { %2103 = dma.done.wait [#allocation3], 32  }
 0x52f   :  { %2104 = vsyncadd [#allocation3], 4294967264 }
 0x530   :  { %1737 = vsyncpa [#allocation3], 1 }

</bundles_post_ra>
